<compile_context>
chip_gen: v7x
topology: tpu7x:2x2x1
jax: 0.10.0
libtpu: 0.0.40
codegen_flags: <defaults>
</compile_context>

<pallas_src>
import math
from functools import partial

import jax
import jax.numpy as jnp
from jax import lax
from jax.experimental import pallas as pl
from jax.experimental.pallas import tpu as pltpu

_NEG_BIG = -1e30                            # finite "-inf" sentinel
_TRANS_B = (((1,), (1,)), ((), ()))         # contract dim 1 of both operands: A @ B.T


def _gat_kernel(coef_ref, wx_ref, wxt_ref, awx_ref, awxt_ref, adj_ref, o_ref, *,
                n_heads, n_channels):
    """One block of destination-node rows, all attention heads fused.

    coef_ref: (1, C)    SMEM scalar table: 0.4 * a
    wx_ref:   (BR, HC)  projected features of this block's rows
    wxt_ref:  (HC, N)   projected features of all nodes, neighbor axis on lanes
    awx_ref:  (BR, H)   per-row  sum_c a_c * wx[:, h, c]
    awxt_ref: (H, N)    per-node sum_c a_c * wx[:, h, c], neighbor axis on lanes
    adj_ref:  (BR, N)   int8 adjacency rows of this block
    o_ref:    (BR, HC)  output rows, heads concatenated (lane-dense, single store)
    """
    h, c = n_heads, n_channels

    # Additive mask, folded into the logit accumulator's initial value.
    adj = adj_ref[...].astype(jnp.int32)
    mask_bias = jnp.where(adj == 0, jnp.float32(_NEG_BIG), jnp.float32(0.0))

    head_outs = []
    for hd in range(h):
        base = hd * c

        # LeakyReLU(0.2)(s) == 0.6*s + 0.4*|s|.  The linear part of
        # e = sum_c a_c * leaky(wx_i_c + wx_j_c) collapses to the precomputed
        # matvec awx; only the |.| part needs per-channel (BR, N) passes.
        e = mask_bias + 0.6 * (awx_ref[:, hd:hd + 1] + awxt_ref[hd:hd + 1, :])

        ch = 0
        while ch < c:                       # channel pairs: half the e RMW traffic
            s0 = jnp.abs(wx_ref[:, base + ch:base + ch + 1]
                         + wxt_ref[base + ch:base + ch + 1, :])
            t = coef_ref[0, ch] * s0
            if ch + 1 < c:
                s1 = jnp.abs(wx_ref[:, base + ch + 1:base + ch + 2]
                             + wxt_ref[base + ch + 1:base + ch + 2, :])
                t = t + coef_ref[0, ch + 1] * s1
            e = e + t
            ch += 2

        # softmax over the neighbor axis (j); exact divide for reference parity.
        m = jnp.max(e, axis=1, keepdims=True)
        p = jnp.exp(e - m)
        denom = jnp.sum(p, axis=1, keepdims=True)
        attn = p * (1.0 / denom)

        # TODO(synk): train-time Dropout(0.6) on attn omitted (eval semantics).

        # out_h[i, f] = sum_j attn[i, j] * wx[j, hd, f]   (MXU, contraction over N)
        head_outs.append(lax.dot_general(
            attn, wxt_ref[base:base + c, :], _TRANS_B,
            preferred_element_type=jnp.float32))

    # Single lane-dense store of the whole (BR, H*C) output block.
    o_ref[...] = jnp.concatenate(head_outs, axis=1).astype(o_ref.dtype)


def _pick_block_rows(n):
    # Prefer >= 2 row blocks so both v7x TensorCores get work under the
    # "parallel" grid axis, and the largest such block to amortize the
    # ~0.35 us/step grid overhead.
    for br in (512, 256, 128):
        if n % br == 0 and n // br >= 2:
            return br
    for br in (512, 256, 128):
        if n % br == 0:
            return br
    return n          # small / oddly-sized graphs: single row block


def gat_forward(x, adj, W_weight, a_weight, n_att_heads):
    """Pallas GAT forward (concat=True, dynamic attention, eval-mode dropout).

    x:        (N, D)    float32 node features
    adj:      (N, N)    adjacency (0/1), shared by all heads
    W_weight: (H*C, D)  torch nn.Linear weight layout (out_features, in_features)
    a_weight: (1, C)    torch nn.Linear weight layout
    returns:  (N, H*C)  float32
    """
    n, d = x.shape
    hc = W_weight.shape[0]
    assert hc % n_att_heads == 0
    h = n_att_heads
    c = hc // h

    # Hoisted projection: one full-efficiency XLA matmul, not one per grid step.
    wx = jnp.dot(x, W_weight.T)                                        # (N, HC)
    wxt = wx.T                                                         # (HC, N)
    awx = jnp.einsum("nhc,c->nh", wx.reshape(n, h, c), a_weight[0])    # (N, H)
    awxt = awx.T                                                       # (H, N)
    coef = (0.4 * a_weight).astype(jnp.float32)                        # (1, C)
    adj_i8 = (adj != 0).astype(jnp.int8)                               # compact mask stream

    br = _pick_block_rows(n)
    grid = (n // br,)

    kernel = partial(_gat_kernel, n_heads=h, n_channels=c)

    return pl.pallas_call(
        kernel,
        out_shape=jax.ShapeDtypeStruct((n, hc), jnp.float32),
        grid_spec=pltpu.PrefetchScalarGridSpec(
            num_scalar_prefetch=0,
            grid=grid,
            in_specs=[
                pl.BlockSpec(memory_space=pltpu.MemorySpace.SMEM),   # coef scalar table
                pl.BlockSpec((br, hc), lambda i: (i, 0)),            # wx: row block
                pl.BlockSpec((hc, n), lambda i: (0, 0)),             # wxT: resident
                pl.BlockSpec((br, h), lambda i: (i, 0)),             # awx: row block
                pl.BlockSpec((h, n), lambda i: (0, 0)),              # awxT: resident
                pl.BlockSpec((br, n), lambda i: (i, 0)),             # adj int8: row block
            ],
            out_specs=pl.BlockSpec((br, hc), lambda i: (i, 0)),      # lane-dense output
        ),
        compiler_params=pltpu.CompilerParams(
            dimension_semantics=("parallel",),      # row blocks split across v7x TCs
            # 64 MiB is fine on v5e/v6e (128 MiB physical); actual usage here is
            # far below v7x's 64 MiB for these block sizes.
            vmem_limit_bytes=64 * 1024 * 1024,
        ),
    )(coef, wx, wxt, awx, awxt, adj_i8)


def gat_reference(x, adj, W_weight, a_weight, n_att_heads):
    """Pure-JAX reference mirroring the torch forward (eval mode)."""
    n, _ = x.shape
    hc = W_weight.shape[0]
    c = hc // n_att_heads
    wx = (x @ W_weight.T).reshape(n, n_att_heads, c)          # (N, H, C)
    s = wx[:, None, :, :] + wx[None, :, :, :]                 # (N, N, H, C)
    s = jnp.where(s > 0, s, 0.2 * s)
    e = jnp.einsum("ijhc,c->ijh", s, a_weight[0])             # (N, N, H)
    e = jnp.where(adj[:, :, None] == 0.0, -jnp.inf, e)
    a = jax.nn.softmax(e, axis=1)
    xh = jnp.einsum("ijh,jhf->ihf", a, wx)                    # (N, H, C)
    return xh.reshape(n, n_att_heads * c)


def _make_inputs(key, n, inp_dim, out_dim, heads):
    c = out_dim // heads
    k_w, k_a, k_x, k_adj = jax.random.split(key, 4)
    # Deterministic kaiming-uniform-style init (fan_in, gain=sqrt(2)).
    bound_w = math.sqrt(2.0) * math.sqrt(3.0 / inp_dim)
    W_weight = jax.random.uniform(k_w, (heads * c, inp_dim), jnp.float32,
                                  minval=-bound_w, maxval=bound_w)
    bound_a = math.sqrt(2.0) * math.sqrt(3.0 / c)
    a_weight = jax.random.uniform(k_a, (1, c), jnp.float32,
                                  minval=-bound_a, maxval=bound_a)
    x = jax.random.normal(k_x, (n, inp_dim), jnp.float32)
    adj = (jax.random.uniform(k_adj, (n, n)) > 0.4).astype(jnp.float32)
    adj = adj.at[jnp.arange(n), jnp.arange(n)].set(1.0)       # self-loops
    return x, adj, W_weight, a_weight


if __name__ == "__main__":
    HEADS = 4
    # (n_nodes, inp_dim, out_dim): small case consistent with the module, plus
    # a larger case that exercises the row-block grid (BR=128, grid=(2,)).
    for (N, INP_DIM, OUT_DIM) in ((8, 32, 32), (256, 32, 32)):
        key = jax.random.PRNGKey(0)
        x, adj, W_w, a_w = _make_inputs(key, N, INP_DIM, OUT_DIM, HEADS)

        out = jax.block_until_ready(gat_forward(x, adj, W_w, a_w, HEADS))
        ref = gat_reference(x, adj, W_w, a_w, HEADS)

        assert out.shape == (N, OUT_DIM)
        err = float(jnp.max(jnp.abs(out - ref)))
        assert jnp.allclose(out, ref, rtol=2e-3, atol=2e-3), (
            f"N={N}: max abs err = {err}")

    print("KERNEL_OK")
</pallas_src>

<mosaic_0001>
module attributes {stable_mosaic.version = 11 : i64} {
  func.func @_gat_kernel(%arg0: i32, %arg1: memref<1x8xf32, #tpu.memory_space<smem>>, %arg2: memref<8x32xf32, #tpu.memory_space<vmem>>, %arg3: memref<32x8xf32, #tpu.memory_space<vmem>>, %arg4: memref<8x4xf32, #tpu.memory_space<vmem>>, %arg5: memref<4x8xf32, #tpu.memory_space<vmem>>, %arg6: memref<8x8xi8, #tpu.memory_space<vmem>>, %arg7: memref<8x32xf32, #tpu.memory_space<vmem>>) attributes {dimension_semantics = [#tpu.dimension_semantics<parallel>], iteration_bounds = array<i64: 1>, scalar_prefetch = 0 : i64, scratch_operands = 0 : i64, tpu.core_type = #tpu.core_type<tc>, window_params = [{transform_indices = @transform_0, window_bounds = array<i64: 1, 8>}, {transform_indices = @transform_1, window_bounds = array<i64: 8, 32>}, {pipeline_mode = #tpu.pipeline_mode<synchronous>, transform_indices = @transform_2, window_bounds = array<i64: 32, 8>}, {transform_indices = @transform_3, window_bounds = array<i64: 8, 4>}, {pipeline_mode = #tpu.pipeline_mode<synchronous>, transform_indices = @transform_4, window_bounds = array<i64: 4, 8>}, {transform_indices = @transform_5, window_bounds = array<i64: 8, 8>}, {transform_indices = @transform_6, window_bounds = array<i64: 8, 32>}]} {
    %c0 = arith.constant 0 : index
    %c0_0 = arith.constant 0 : index
    %0 = vector.load %arg6[%c0, %c0_0] : memref<8x8xi8, #tpu.memory_space<vmem>>, vector<8x8xi8>
    %1 = arith.extsi %0 : vector<8x8xi8> to vector<8x8xi32>
    %c0_i32 = arith.constant 0 : i32
    %2 = vector.broadcast %c0_i32 : i32 to vector<8x8xi32>
    %3 = arith.cmpi eq, %1, %2 : vector<8x8xi32>
    %cst = arith.constant -1.000000e+30 : f32
    %cst_1 = arith.constant 0.000000e+00 : f32
    %4 = vector.broadcast %cst : f32 to vector<8x8xf32>
    %5 = vector.broadcast %cst_1 : f32 to vector<8x8xf32>
    %6 = arith.select %3, %4, %5 : vector<8x8xi1>, vector<8x8xf32>
    %c0_2 = arith.constant 0 : index
    %c0_3 = arith.constant 0 : index
    %7 = vector.load %arg4[%c0_2, %c0_3] : memref<8x4xf32, #tpu.memory_space<vmem>>, vector<8x1xf32>
    %c0_4 = arith.constant 0 : index
    %c0_5 = arith.constant 0 : index
    %8 = vector.load %arg5[%c0_4, %c0_5] : memref<4x8xf32, #tpu.memory_space<vmem>>, vector<1x8xf32>
    %9 = vector.broadcast %7 : vector<8x1xf32> to vector<8x8xf32>
    %10 = vector.broadcast %8 : vector<1x8xf32> to vector<8x8xf32>
    %11 = arith.addf %9, %10 : vector<8x8xf32>
    %cst_6 = arith.constant 6.000000e-01 : f32
    %12 = vector.broadcast %cst_6 : f32 to vector<8x8xf32>
    %13 = arith.mulf %12, %11 : vector<8x8xf32>
    %14 = arith.addf %6, %13 : vector<8x8xf32>
    %c0_7 = arith.constant 0 : index
    %c0_8 = arith.constant 0 : index
    %15 = vector.load %arg2[%c0_7, %c0_8] : memref<8x32xf32, #tpu.memory_space<vmem>>, vector<8x1xf32>
    %c0_9 = arith.constant 0 : index
    %c0_10 = arith.constant 0 : index
    %16 = vector.load %arg3[%c0_9, %c0_10] : memref<32x8xf32, #tpu.memory_space<vmem>>, vector<1x8xf32>
    %17 = vector.broadcast %15 : vector<8x1xf32> to vector<8x8xf32>
    %18 = vector.broadcast %16 : vector<1x8xf32> to vector<8x8xf32>
    %19 = arith.addf %17, %18 : vector<8x8xf32>
    %20 = math.absf %19 : vector<8x8xf32>
    %c0_11 = arith.constant 0 : index
    %c0_12 = arith.constant 0 : index
    %21 = memref.load %arg1[%c0_11, %c0_12] : memref<1x8xf32, #tpu.memory_space<smem>>
    %22 = vector.broadcast %21 : f32 to vector<8x8xf32>
    %23 = arith.mulf %22, %20 : vector<8x8xf32>
    %c0_13 = arith.constant 0 : index
    %c1 = arith.constant 1 : index
    %24 = vector.load %arg2[%c0_13, %c1] : memref<8x32xf32, #tpu.memory_space<vmem>>, vector<8x1xf32>
    %c1_14 = arith.constant 1 : index
    %c0_15 = arith.constant 0 : index
    %25 = vector.load %arg3[%c1_14, %c0_15] : memref<32x8xf32, #tpu.memory_space<vmem>>, vector<1x8xf32>
    %26 = vector.broadcast %24 : vector<8x1xf32> to vector<8x8xf32>
    %27 = vector.broadcast %25 : vector<1x8xf32> to vector<8x8xf32>
    %28 = arith.addf %26, %27 : vector<8x8xf32>
    %29 = math.absf %28 : vector<8x8xf32>
    %c0_16 = arith.constant 0 : index
    %c1_17 = arith.constant 1 : index
    %30 = memref.load %arg1[%c0_16, %c1_17] : memref<1x8xf32, #tpu.memory_space<smem>>
    %31 = vector.broadcast %30 : f32 to vector<8x8xf32>
    %32 = arith.mulf %31, %29 : vector<8x8xf32>
    %33 = arith.addf %23, %32 : vector<8x8xf32>
    %34 = arith.addf %14, %33 : vector<8x8xf32>
    %c0_18 = arith.constant 0 : index
    %c2 = arith.constant 2 : index
    %35 = vector.load %arg2[%c0_18, %c2] : memref<8x32xf32, #tpu.memory_space<vmem>>, vector<8x1xf32>
    %c2_19 = arith.constant 2 : index
    %c0_20 = arith.constant 0 : index
    %36 = vector.load %arg3[%c2_19, %c0_20] : memref<32x8xf32, #tpu.memory_space<vmem>>, vector<1x8xf32>
    %37 = vector.broadcast %35 : vector<8x1xf32> to vector<8x8xf32>
    %38 = vector.broadcast %36 : vector<1x8xf32> to vector<8x8xf32>
    %39 = arith.addf %37, %38 : vector<8x8xf32>
    %40 = math.absf %39 : vector<8x8xf32>
    %c0_21 = arith.constant 0 : index
    %c2_22 = arith.constant 2 : index
    %41 = memref.load %arg1[%c0_21, %c2_22] : memref<1x8xf32, #tpu.memory_space<smem>>
    %42 = vector.broadcast %41 : f32 to vector<8x8xf32>
    %43 = arith.mulf %42, %40 : vector<8x8xf32>
    %c0_23 = arith.constant 0 : index
    %c3 = arith.constant 3 : index
    %44 = vector.load %arg2[%c0_23, %c3] : memref<8x32xf32, #tpu.memory_space<vmem>>, vector<8x1xf32>
    %c3_24 = arith.constant 3 : index
    %c0_25 = arith.constant 0 : index
    %45 = vector.load %arg3[%c3_24, %c0_25] : memref<32x8xf32, #tpu.memory_space<vmem>>, vector<1x8xf32>
    %46 = vector.broadcast %44 : vector<8x1xf32> to vector<8x8xf32>
    %47 = vector.broadcast %45 : vector<1x8xf32> to vector<8x8xf32>
    %48 = arith.addf %46, %47 : vector<8x8xf32>
    %49 = math.absf %48 : vector<8x8xf32>
    %c0_26 = arith.constant 0 : index
    %c3_27 = arith.constant 3 : index
    %50 = memref.load %arg1[%c0_26, %c3_27] : memref<1x8xf32, #tpu.memory_space<smem>>
    %51 = vector.broadcast %50 : f32 to vector<8x8xf32>
    %52 = arith.mulf %51, %49 : vector<8x8xf32>
    %53 = arith.addf %43, %52 : vector<8x8xf32>
    %54 = arith.addf %34, %53 : vector<8x8xf32>
    %c0_28 = arith.constant 0 : index
    %c4 = arith.constant 4 : index
    %55 = vector.load %arg2[%c0_28, %c4] : memref<8x32xf32, #tpu.memory_space<vmem>>, vector<8x1xf32>
    %c4_29 = arith.constant 4 : index
    %c0_30 = arith.constant 0 : index
    %56 = vector.load %arg3[%c4_29, %c0_30] : memref<32x8xf32, #tpu.memory_space<vmem>>, vector<1x8xf32>
    %57 = vector.broadcast %55 : vector<8x1xf32> to vector<8x8xf32>
    %58 = vector.broadcast %56 : vector<1x8xf32> to vector<8x8xf32>
    %59 = arith.addf %57, %58 : vector<8x8xf32>
    %60 = math.absf %59 : vector<8x8xf32>
    %c0_31 = arith.constant 0 : index
    %c4_32 = arith.constant 4 : index
    %61 = memref.load %arg1[%c0_31, %c4_32] : memref<1x8xf32, #tpu.memory_space<smem>>
    %62 = vector.broadcast %61 : f32 to vector<8x8xf32>
    %63 = arith.mulf %62, %60 : vector<8x8xf32>
    %c0_33 = arith.constant 0 : index
    %c5 = arith.constant 5 : index
    %64 = vector.load %arg2[%c0_33, %c5] : memref<8x32xf32, #tpu.memory_space<vmem>>, vector<8x1xf32>
    %c5_34 = arith.constant 5 : index
    %c0_35 = arith.constant 0 : index
    %65 = vector.load %arg3[%c5_34, %c0_35] : memref<32x8xf32, #tpu.memory_space<vmem>>, vector<1x8xf32>
    %66 = vector.broadcast %64 : vector<8x1xf32> to vector<8x8xf32>
    %67 = vector.broadcast %65 : vector<1x8xf32> to vector<8x8xf32>
    %68 = arith.addf %66, %67 : vector<8x8xf32>
    %69 = math.absf %68 : vector<8x8xf32>
    %c0_36 = arith.constant 0 : index
    %c5_37 = arith.constant 5 : index
    %70 = memref.load %arg1[%c0_36, %c5_37] : memref<1x8xf32, #tpu.memory_space<smem>>
    %71 = vector.broadcast %70 : f32 to vector<8x8xf32>
    %72 = arith.mulf %71, %69 : vector<8x8xf32>
    %73 = arith.addf %63, %72 : vector<8x8xf32>
    %74 = arith.addf %54, %73 : vector<8x8xf32>
    %c0_38 = arith.constant 0 : index
    %c6 = arith.constant 6 : index
    %75 = vector.load %arg2[%c0_38, %c6] : memref<8x32xf32, #tpu.memory_space<vmem>>, vector<8x1xf32>
    %c6_39 = arith.constant 6 : index
    %c0_40 = arith.constant 0 : index
    %76 = vector.load %arg3[%c6_39, %c0_40] : memref<32x8xf32, #tpu.memory_space<vmem>>, vector<1x8xf32>
    %77 = vector.broadcast %75 : vector<8x1xf32> to vector<8x8xf32>
    %78 = vector.broadcast %76 : vector<1x8xf32> to vector<8x8xf32>
    %79 = arith.addf %77, %78 : vector<8x8xf32>
    %80 = math.absf %79 : vector<8x8xf32>
    %c0_41 = arith.constant 0 : index
    %c6_42 = arith.constant 6 : index
    %81 = memref.load %arg1[%c0_41, %c6_42] : memref<1x8xf32, #tpu.memory_space<smem>>
    %82 = vector.broadcast %81 : f32 to vector<8x8xf32>
    %83 = arith.mulf %82, %80 : vector<8x8xf32>
    %c0_43 = arith.constant 0 : index
    %c7 = arith.constant 7 : index
    %84 = vector.load %arg2[%c0_43, %c7] : memref<8x32xf32, #tpu.memory_space<vmem>>, vector<8x1xf32>
    %c7_44 = arith.constant 7 : index
    %c0_45 = arith.constant 0 : index
    %85 = vector.load %arg3[%c7_44, %c0_45] : memref<32x8xf32, #tpu.memory_space<vmem>>, vector<1x8xf32>
    %86 = vector.broadcast %84 : vector<8x1xf32> to vector<8x8xf32>
    %87 = vector.broadcast %85 : vector<1x8xf32> to vector<8x8xf32>
    %88 = arith.addf %86, %87 : vector<8x8xf32>
    %89 = math.absf %88 : vector<8x8xf32>
    %c0_46 = arith.constant 0 : index
    %c7_47 = arith.constant 7 : index
    %90 = memref.load %arg1[%c0_46, %c7_47] : memref<1x8xf32, #tpu.memory_space<smem>>
    %91 = vector.broadcast %90 : f32 to vector<8x8xf32>
    %92 = arith.mulf %91, %89 : vector<8x8xf32>
    %93 = arith.addf %83, %92 : vector<8x8xf32>
    %94 = arith.addf %74, %93 : vector<8x8xf32>
    %cst_48 = arith.constant dense<0xFF800000> : vector<8xf32>
    %95 = vector.multi_reduction <maximumf>, %94, %cst_48 [1] : vector<8x8xf32> to vector<8xf32>
    %96 = vector.shape_cast %95 : vector<8xf32> to vector<8x1xf32>
    %97 = vector.broadcast %96 : vector<8x1xf32> to vector<8x8xf32>
    %98 = arith.subf %94, %97 : vector<8x8xf32>
    %99 = math.exp %98 : vector<8x8xf32>
    %cst_49 = arith.constant dense<0.000000e+00> : vector<8xf32>
    %100 = vector.multi_reduction <add>, %99, %cst_49 [1] : vector<8x8xf32> to vector<8xf32>
    %101 = vector.shape_cast %100 : vector<8xf32> to vector<8x1xf32>
    %cst_50 = arith.constant 1.000000e+00 : f32
    %102 = vector.broadcast %cst_50 : f32 to vector<8x1xf32>
    %103 = arith.divf %102, %101 : vector<8x1xf32>
    %104 = vector.broadcast %103 : vector<8x1xf32> to vector<8x8xf32>
    %105 = arith.mulf %99, %104 : vector<8x8xf32>
    %c0_51 = arith.constant 0 : index
    %c0_52 = arith.constant 0 : index
    %106 = vector.load %arg3[%c0_51, %c0_52] : memref<32x8xf32, #tpu.memory_space<vmem>>, vector<8x8xf32>
    %cst_53 = arith.constant dense<0.000000e+00> : vector<8x8xf32>
    %107 = tpu.matmul %105, %106, %cst_53 {dimension_numbers = #tpu.dot_dimension_numbers<[1], [1], [0], [0], [0, 0, 1, 0], [], []>} : vector<8x8xf32>, vector<8x8xf32>, vector<8x8xf32> -> vector<8x8xf32>
    %c0_54 = arith.constant 0 : index
    %c1_55 = arith.constant 1 : index
    %108 = vector.load %arg4[%c0_54, %c1_55] : memref<8x4xf32, #tpu.memory_space<vmem>>, vector<8x1xf32>
    %c1_56 = arith.constant 1 : index
    %c0_57 = arith.constant 0 : index
    %109 = vector.load %arg5[%c1_56, %c0_57] : memref<4x8xf32, #tpu.memory_space<vmem>>, vector<1x8xf32>
    %110 = vector.broadcast %108 : vector<8x1xf32> to vector<8x8xf32>
    %111 = vector.broadcast %109 : vector<1x8xf32> to vector<8x8xf32>
    %112 = arith.addf %110, %111 : vector<8x8xf32>
    %cst_58 = arith.constant 6.000000e-01 : f32
    %113 = vector.broadcast %cst_58 : f32 to vector<8x8xf32>
    %114 = arith.mulf %113, %112 : vector<8x8xf32>
    %115 = arith.addf %6, %114 : vector<8x8xf32>
    %c0_59 = arith.constant 0 : index
    %c8 = arith.constant 8 : index
    %116 = vector.load %arg2[%c0_59, %c8] : memref<8x32xf32, #tpu.memory_space<vmem>>, vector<8x1xf32>
    %c8_60 = arith.constant 8 : index
    %c0_61 = arith.constant 0 : index
    %117 = vector.load %arg3[%c8_60, %c0_61] : memref<32x8xf32, #tpu.memory_space<vmem>>, vector<1x8xf32>
    %118 = vector.broadcast %116 : vector<8x1xf32> to vector<8x8xf32>
    %119 = vector.broadcast %117 : vector<1x8xf32> to vector<8x8xf32>
    %120 = arith.addf %118, %119 : vector<8x8xf32>
    %121 = math.absf %120 : vector<8x8xf32>
    %c0_62 = arith.constant 0 : index
    %c0_63 = arith.constant 0 : index
    %122 = memref.load %arg1[%c0_62, %c0_63] : memref<1x8xf32, #tpu.memory_space<smem>>
    %123 = vector.broadcast %122 : f32 to vector<8x8xf32>
    %124 = arith.mulf %123, %121 : vector<8x8xf32>
    %c0_64 = arith.constant 0 : index
    %c9 = arith.constant 9 : index
    %125 = vector.load %arg2[%c0_64, %c9] : memref<8x32xf32, #tpu.memory_space<vmem>>, vector<8x1xf32>
    %c9_65 = arith.constant 9 : index
    %c0_66 = arith.constant 0 : index
    %126 = vector.load %arg3[%c9_65, %c0_66] : memref<32x8xf32, #tpu.memory_space<vmem>>, vector<1x8xf32>
    %127 = vector.broadcast %125 : vector<8x1xf32> to vector<8x8xf32>
    %128 = vector.broadcast %126 : vector<1x8xf32> to vector<8x8xf32>
    %129 = arith.addf %127, %128 : vector<8x8xf32>
    %130 = math.absf %129 : vector<8x8xf32>
    %c0_67 = arith.constant 0 : index
    %c1_68 = arith.constant 1 : index
    %131 = memref.load %arg1[%c0_67, %c1_68] : memref<1x8xf32, #tpu.memory_space<smem>>
    %132 = vector.broadcast %131 : f32 to vector<8x8xf32>
    %133 = arith.mulf %132, %130 : vector<8x8xf32>
    %134 = arith.addf %124, %133 : vector<8x8xf32>
    %135 = arith.addf %115, %134 : vector<8x8xf32>
    %c0_69 = arith.constant 0 : index
    %c10 = arith.constant 10 : index
    %136 = vector.load %arg2[%c0_69, %c10] : memref<8x32xf32, #tpu.memory_space<vmem>>, vector<8x1xf32>
    %c10_70 = arith.constant 10 : index
    %c0_71 = arith.constant 0 : index
    %137 = vector.load %arg3[%c10_70, %c0_71] : memref<32x8xf32, #tpu.memory_space<vmem>>, vector<1x8xf32>
    %138 = vector.broadcast %136 : vector<8x1xf32> to vector<8x8xf32>
    %139 = vector.broadcast %137 : vector<1x8xf32> to vector<8x8xf32>
    %140 = arith.addf %138, %139 : vector<8x8xf32>
    %141 = math.absf %140 : vector<8x8xf32>
    %c0_72 = arith.constant 0 : index
    %c2_73 = arith.constant 2 : index
    %142 = memref.load %arg1[%c0_72, %c2_73] : memref<1x8xf32, #tpu.memory_space<smem>>
    %143 = vector.broadcast %142 : f32 to vector<8x8xf32>
    %144 = arith.mulf %143, %141 : vector<8x8xf32>
    %c0_74 = arith.constant 0 : index
    %c11 = arith.constant 11 : index
    %145 = vector.load %arg2[%c0_74, %c11] : memref<8x32xf32, #tpu.memory_space<vmem>>, vector<8x1xf32>
    %c11_75 = arith.constant 11 : index
    %c0_76 = arith.constant 0 : index
    %146 = vector.load %arg3[%c11_75, %c0_76] : memref<32x8xf32, #tpu.memory_space<vmem>>, vector<1x8xf32>
    %147 = vector.broadcast %145 : vector<8x1xf32> to vector<8x8xf32>
    %148 = vector.broadcast %146 : vector<1x8xf32> to vector<8x8xf32>
    %149 = arith.addf %147, %148 : vector<8x8xf32>
    %150 = math.absf %149 : vector<8x8xf32>
    %c0_77 = arith.constant 0 : index
    %c3_78 = arith.constant 3 : index
    %151 = memref.load %arg1[%c0_77, %c3_78] : memref<1x8xf32, #tpu.memory_space<smem>>
    %152 = vector.broadcast %151 : f32 to vector<8x8xf32>
    %153 = arith.mulf %152, %150 : vector<8x8xf32>
    %154 = arith.addf %144, %153 : vector<8x8xf32>
    %155 = arith.addf %135, %154 : vector<8x8xf32>
    %c0_79 = arith.constant 0 : index
    %c12 = arith.constant 12 : index
    %156 = vector.load %arg2[%c0_79, %c12] : memref<8x32xf32, #tpu.memory_space<vmem>>, vector<8x1xf32>
    %c12_80 = arith.constant 12 : index
    %c0_81 = arith.constant 0 : index
    %157 = vector.load %arg3[%c12_80, %c0_81] : memref<32x8xf32, #tpu.memory_space<vmem>>, vector<1x8xf32>
    %158 = vector.broadcast %156 : vector<8x1xf32> to vector<8x8xf32>
    %159 = vector.broadcast %157 : vector<1x8xf32> to vector<8x8xf32>
    %160 = arith.addf %158, %159 : vector<8x8xf32>
    %161 = math.absf %160 : vector<8x8xf32>
    %c0_82 = arith.constant 0 : index
    %c4_83 = arith.constant 4 : index
    %162 = memref.load %arg1[%c0_82, %c4_83] : memref<1x8xf32, #tpu.memory_space<smem>>
    %163 = vector.broadcast %162 : f32 to vector<8x8xf32>
    %164 = arith.mulf %163, %161 : vector<8x8xf32>
    %c0_84 = arith.constant 0 : index
    %c13 = arith.constant 13 : index
    %165 = vector.load %arg2[%c0_84, %c13] : memref<8x32xf32, #tpu.memory_space<vmem>>, vector<8x1xf32>
    %c13_85 = arith.constant 13 : index
    %c0_86 = arith.constant 0 : index
    %166 = vector.load %arg3[%c13_85, %c0_86] : memref<32x8xf32, #tpu.memory_space<vmem>>, vector<1x8xf32>
    %167 = vector.broadcast %165 : vector<8x1xf32> to vector<8x8xf32>
    %168 = vector.broadcast %166 : vector<1x8xf32> to vector<8x8xf32>
    %169 = arith.addf %167, %168 : vector<8x8xf32>
    %170 = math.absf %169 : vector<8x8xf32>
    %c0_87 = arith.constant 0 : index
    %c5_88 = arith.constant 5 : index
    %171 = memref.load %arg1[%c0_87, %c5_88] : memref<1x8xf32, #tpu.memory_space<smem>>
    %172 = vector.broadcast %171 : f32 to vector<8x8xf32>
    %173 = arith.mulf %172, %170 : vector<8x8xf32>
    %174 = arith.addf %164, %173 : vector<8x8xf32>
    %175 = arith.addf %155, %174 : vector<8x8xf32>
    %c0_89 = arith.constant 0 : index
    %c14 = arith.constant 14 : index
    %176 = vector.load %arg2[%c0_89, %c14] : memref<8x32xf32, #tpu.memory_space<vmem>>, vector<8x1xf32>
    %c14_90 = arith.constant 14 : index
    %c0_91 = arith.constant 0 : index
    %177 = vector.load %arg3[%c14_90, %c0_91] : memref<32x8xf32, #tpu.memory_space<vmem>>, vector<1x8xf32>
    %178 = vector.broadcast %176 : vector<8x1xf32> to vector<8x8xf32>
    %179 = vector.broadcast %177 : vector<1x8xf32> to vector<8x8xf32>
    %180 = arith.addf %178, %179 : vector<8x8xf32>
    %181 = math.absf %180 : vector<8x8xf32>
    %c0_92 = arith.constant 0 : index
    %c6_93 = arith.constant 6 : index
    %182 = memref.load %arg1[%c0_92, %c6_93] : memref<1x8xf32, #tpu.memory_space<smem>>
    %183 = vector.broadcast %182 : f32 to vector<8x8xf32>
    %184 = arith.mulf %183, %181 : vector<8x8xf32>
    %c0_94 = arith.constant 0 : index
    %c15 = arith.constant 15 : index
    %185 = vector.load %arg2[%c0_94, %c15] : memref<8x32xf32, #tpu.memory_space<vmem>>, vector<8x1xf32>
    %c15_95 = arith.constant 15 : index
    %c0_96 = arith.constant 0 : index
    %186 = vector.load %arg3[%c15_95, %c0_96] : memref<32x8xf32, #tpu.memory_space<vmem>>, vector<1x8xf32>
    %187 = vector.broadcast %185 : vector<8x1xf32> to vector<8x8xf32>
    %188 = vector.broadcast %186 : vector<1x8xf32> to vector<8x8xf32>
    %189 = arith.addf %187, %188 : vector<8x8xf32>
    %190 = math.absf %189 : vector<8x8xf32>
    %c0_97 = arith.constant 0 : index
    %c7_98 = arith.constant 7 : index
    %191 = memref.load %arg1[%c0_97, %c7_98] : memref<1x8xf32, #tpu.memory_space<smem>>
    %192 = vector.broadcast %191 : f32 to vector<8x8xf32>
    %193 = arith.mulf %192, %190 : vector<8x8xf32>
    %194 = arith.addf %184, %193 : vector<8x8xf32>
    %195 = arith.addf %175, %194 : vector<8x8xf32>
    %cst_99 = arith.constant dense<0xFF800000> : vector<8xf32>
    %196 = vector.multi_reduction <maximumf>, %195, %cst_99 [1] : vector<8x8xf32> to vector<8xf32>
    %197 = vector.shape_cast %196 : vector<8xf32> to vector<8x1xf32>
    %198 = vector.broadcast %197 : vector<8x1xf32> to vector<8x8xf32>
    %199 = arith.subf %195, %198 : vector<8x8xf32>
    %200 = math.exp %199 : vector<8x8xf32>
    %cst_100 = arith.constant dense<0.000000e+00> : vector<8xf32>
    %201 = vector.multi_reduction <add>, %200, %cst_100 [1] : vector<8x8xf32> to vector<8xf32>
    %202 = vector.shape_cast %201 : vector<8xf32> to vector<8x1xf32>
    %cst_101 = arith.constant 1.000000e+00 : f32
    %203 = vector.broadcast %cst_101 : f32 to vector<8x1xf32>
    %204 = arith.divf %203, %202 : vector<8x1xf32>
    %205 = vector.broadcast %204 : vector<8x1xf32> to vector<8x8xf32>
    %206 = arith.mulf %200, %205 : vector<8x8xf32>
    %c8_102 = arith.constant 8 : index
    %c0_103 = arith.constant 0 : index
    %207 = vector.load %arg3[%c8_102, %c0_103] : memref<32x8xf32, #tpu.memory_space<vmem>>, vector<8x8xf32>
    %cst_104 = arith.constant dense<0.000000e+00> : vector<8x8xf32>
    %208 = tpu.matmul %206, %207, %cst_104 {dimension_numbers = #tpu.dot_dimension_numbers<[1], [1], [0], [0], [0, 0, 1, 0], [], []>} : vector<8x8xf32>, vector<8x8xf32>, vector<8x8xf32> -> vector<8x8xf32>
    %c0_105 = arith.constant 0 : index
    %c2_106 = arith.constant 2 : index
    %209 = vector.load %arg4[%c0_105, %c2_106] : memref<8x4xf32, #tpu.memory_space<vmem>>, vector<8x1xf32>
    %c2_107 = arith.constant 2 : index
    %c0_108 = arith.constant 0 : index
    %210 = vector.load %arg5[%c2_107, %c0_108] : memref<4x8xf32, #tpu.memory_space<vmem>>, vector<1x8xf32>
    %211 = vector.broadcast %209 : vector<8x1xf32> to vector<8x8xf32>
    %212 = vector.broadcast %210 : vector<1x8xf32> to vector<8x8xf32>
    %213 = arith.addf %211, %212 : vector<8x8xf32>
    %cst_109 = arith.constant 6.000000e-01 : f32
    %214 = vector.broadcast %cst_109 : f32 to vector<8x8xf32>
    %215 = arith.mulf %214, %213 : vector<8x8xf32>
    %216 = arith.addf %6, %215 : vector<8x8xf32>
    %c0_110 = arith.constant 0 : index
    %c16 = arith.constant 16 : index
    %217 = vector.load %arg2[%c0_110, %c16] : memref<8x32xf32, #tpu.memory_space<vmem>>, vector<8x1xf32>
    %c16_111 = arith.constant 16 : index
    %c0_112 = arith.constant 0 : index
    %218 = vector.load %arg3[%c16_111, %c0_112] : memref<32x8xf32, #tpu.memory_space<vmem>>, vector<1x8xf32>
    %219 = vector.broadcast %217 : vector<8x1xf32> to vector<8x8xf32>
    %220 = vector.broadcast %218 : vector<1x8xf32> to vector<8x8xf32>
    %221 = arith.addf %219, %220 : vector<8x8xf32>
    %222 = math.absf %221 : vector<8x8xf32>
    %c0_113 = arith.constant 0 : index
    %c0_114 = arith.constant 0 : index
    %223 = memref.load %arg1[%c0_113, %c0_114] : memref<1x8xf32, #tpu.memory_space<smem>>
    %224 = vector.broadcast %223 : f32 to vector<8x8xf32>
    %225 = arith.mulf %224, %222 : vector<8x8xf32>
    %c0_115 = arith.constant 0 : index
    %c17 = arith.constant 17 : index
    %226 = vector.load %arg2[%c0_115, %c17] : memref<8x32xf32, #tpu.memory_space<vmem>>, vector<8x1xf32>
    %c17_116 = arith.constant 17 : index
    %c0_117 = arith.constant 0 : index
    %227 = vector.load %arg3[%c17_116, %c0_117] : memref<32x8xf32, #tpu.memory_space<vmem>>, vector<1x8xf32>
    %228 = vector.broadcast %226 : vector<8x1xf32> to vector<8x8xf32>
    %229 = vector.broadcast %227 : vector<1x8xf32> to vector<8x8xf32>
    %230 = arith.addf %228, %229 : vector<8x8xf32>
    %231 = math.absf %230 : vector<8x8xf32>
    %c0_118 = arith.constant 0 : index
    %c1_119 = arith.constant 1 : index
    %232 = memref.load %arg1[%c0_118, %c1_119] : memref<1x8xf32, #tpu.memory_space<smem>>
    %233 = vector.broadcast %232 : f32 to vector<8x8xf32>
    %234 = arith.mulf %233, %231 : vector<8x8xf32>
    %235 = arith.addf %225, %234 : vector<8x8xf32>
    %236 = arith.addf %216, %235 : vector<8x8xf32>
    %c0_120 = arith.constant 0 : index
    %c18 = arith.constant 18 : index
    %237 = vector.load %arg2[%c0_120, %c18] : memref<8x32xf32, #tpu.memory_space<vmem>>, vector<8x1xf32>
    %c18_121 = arith.constant 18 : index
    %c0_122 = arith.constant 0 : index
    %238 = vector.load %arg3[%c18_121, %c0_122] : memref<32x8xf32, #tpu.memory_space<vmem>>, vector<1x8xf32>
    %239 = vector.broadcast %237 : vector<8x1xf32> to vector<8x8xf32>
    %240 = vector.broadcast %238 : vector<1x8xf32> to vector<8x8xf32>
    %241 = arith.addf %239, %240 : vector<8x8xf32>
    %242 = math.absf %241 : vector<8x8xf32>
    %c0_123 = arith.constant 0 : index
    %c2_124 = arith.constant 2 : index
    %243 = memref.load %arg1[%c0_123, %c2_124] : memref<1x8xf32, #tpu.memory_space<smem>>
    %244 = vector.broadcast %243 : f32 to vector<8x8xf32>
    %245 = arith.mulf %244, %242 : vector<8x8xf32>
    %c0_125 = arith.constant 0 : index
    %c19 = arith.constant 19 : index
    %246 = vector.load %arg2[%c0_125, %c19] : memref<8x32xf32, #tpu.memory_space<vmem>>, vector<8x1xf32>
    %c19_126 = arith.constant 19 : index
    %c0_127 = arith.constant 0 : index
    %247 = vector.load %arg3[%c19_126, %c0_127] : memref<32x8xf32, #tpu.memory_space<vmem>>, vector<1x8xf32>
    %248 = vector.broadcast %246 : vector<8x1xf32> to vector<8x8xf32>
    %249 = vector.broadcast %247 : vector<1x8xf32> to vector<8x8xf32>
    %250 = arith.addf %248, %249 : vector<8x8xf32>
    %251 = math.absf %250 : vector<8x8xf32>
    %c0_128 = arith.constant 0 : index
    %c3_129 = arith.constant 3 : index
    %252 = memref.load %arg1[%c0_128, %c3_129] : memref<1x8xf32, #tpu.memory_space<smem>>
    %253 = vector.broadcast %252 : f32 to vector<8x8xf32>
    %254 = arith.mulf %253, %251 : vector<8x8xf32>
    %255 = arith.addf %245, %254 : vector<8x8xf32>
    %256 = arith.addf %236, %255 : vector<8x8xf32>
    %c0_130 = arith.constant 0 : index
    %c20 = arith.constant 20 : index
    %257 = vector.load %arg2[%c0_130, %c20] : memref<8x32xf32, #tpu.memory_space<vmem>>, vector<8x1xf32>
    %c20_131 = arith.constant 20 : index
    %c0_132 = arith.constant 0 : index
    %258 = vector.load %arg3[%c20_131, %c0_132] : memref<32x8xf32, #tpu.memory_space<vmem>>, vector<1x8xf32>
    %259 = vector.broadcast %257 : vector<8x1xf32> to vector<8x8xf32>
    %260 = vector.broadcast %258 : vector<1x8xf32> to vector<8x8xf32>
    %261 = arith.addf %259, %260 : vector<8x8xf32>
    %262 = math.absf %261 : vector<8x8xf32>
    %c0_133 = arith.constant 0 : index
    %c4_134 = arith.constant 4 : index
    %263 = memref.load %arg1[%c0_133, %c4_134] : memref<1x8xf32, #tpu.memory_space<smem>>
    %264 = vector.broadcast %263 : f32 to vector<8x8xf32>
    %265 = arith.mulf %264, %262 : vector<8x8xf32>
    %c0_135 = arith.constant 0 : index
    %c21 = arith.constant 21 : index
    %266 = vector.load %arg2[%c0_135, %c21] : memref<8x32xf32, #tpu.memory_space<vmem>>, vector<8x1xf32>
    %c21_136 = arith.constant 21 : index
    %c0_137 = arith.constant 0 : index
    %267 = vector.load %arg3[%c21_136, %c0_137] : memref<32x8xf32, #tpu.memory_space<vmem>>, vector<1x8xf32>
    %268 = vector.broadcast %266 : vector<8x1xf32> to vector<8x8xf32>
    %269 = vector.broadcast %267 : vector<1x8xf32> to vector<8x8xf32>
    %270 = arith.addf %268, %269 : vector<8x8xf32>
    %271 = math.absf %270 : vector<8x8xf32>
    %c0_138 = arith.constant 0 : index
    %c5_139 = arith.constant 5 : index
    %272 = memref.load %arg1[%c0_138, %c5_139] : memref<1x8xf32, #tpu.memory_space<smem>>
    %273 = vector.broadcast %272 : f32 to vector<8x8xf32>
    %274 = arith.mulf %273, %271 : vector<8x8xf32>
    %275 = arith.addf %265, %274 : vector<8x8xf32>
    %276 = arith.addf %256, %275 : vector<8x8xf32>
    %c0_140 = arith.constant 0 : index
    %c22 = arith.constant 22 : index
    %277 = vector.load %arg2[%c0_140, %c22] : memref<8x32xf32, #tpu.memory_space<vmem>>, vector<8x1xf32>
    %c22_141 = arith.constant 22 : index
    %c0_142 = arith.constant 0 : index
    %278 = vector.load %arg3[%c22_141, %c0_142] : memref<32x8xf32, #tpu.memory_space<vmem>>, vector<1x8xf32>
    %279 = vector.broadcast %277 : vector<8x1xf32> to vector<8x8xf32>
    %280 = vector.broadcast %278 : vector<1x8xf32> to vector<8x8xf32>
    %281 = arith.addf %279, %280 : vector<8x8xf32>
    %282 = math.absf %281 : vector<8x8xf32>
    %c0_143 = arith.constant 0 : index
    %c6_144 = arith.constant 6 : index
    %283 = memref.load %arg1[%c0_143, %c6_144] : memref<1x8xf32, #tpu.memory_space<smem>>
    %284 = vector.broadcast %283 : f32 to vector<8x8xf32>
    %285 = arith.mulf %284, %282 : vector<8x8xf32>
    %c0_145 = arith.constant 0 : index
    %c23 = arith.constant 23 : index
    %286 = vector.load %arg2[%c0_145, %c23] : memref<8x32xf32, #tpu.memory_space<vmem>>, vector<8x1xf32>
    %c23_146 = arith.constant 23 : index
    %c0_147 = arith.constant 0 : index
    %287 = vector.load %arg3[%c23_146, %c0_147] : memref<32x8xf32, #tpu.memory_space<vmem>>, vector<1x8xf32>
    %288 = vector.broadcast %286 : vector<8x1xf32> to vector<8x8xf32>
    %289 = vector.broadcast %287 : vector<1x8xf32> to vector<8x8xf32>
    %290 = arith.addf %288, %289 : vector<8x8xf32>
    %291 = math.absf %290 : vector<8x8xf32>
    %c0_148 = arith.constant 0 : index
    %c7_149 = arith.constant 7 : index
    %292 = memref.load %arg1[%c0_148, %c7_149] : memref<1x8xf32, #tpu.memory_space<smem>>
    %293 = vector.broadcast %292 : f32 to vector<8x8xf32>
    %294 = arith.mulf %293, %291 : vector<8x8xf32>
    %295 = arith.addf %285, %294 : vector<8x8xf32>
    %296 = arith.addf %276, %295 : vector<8x8xf32>
    %cst_150 = arith.constant dense<0xFF800000> : vector<8xf32>
    %297 = vector.multi_reduction <maximumf>, %296, %cst_150 [1] : vector<8x8xf32> to vector<8xf32>
    %298 = vector.shape_cast %297 : vector<8xf32> to vector<8x1xf32>
    %299 = vector.broadcast %298 : vector<8x1xf32> to vector<8x8xf32>
    %300 = arith.subf %296, %299 : vector<8x8xf32>
    %301 = math.exp %300 : vector<8x8xf32>
    %cst_151 = arith.constant dense<0.000000e+00> : vector<8xf32>
    %302 = vector.multi_reduction <add>, %301, %cst_151 [1] : vector<8x8xf32> to vector<8xf32>
    %303 = vector.shape_cast %302 : vector<8xf32> to vector<8x1xf32>
    %cst_152 = arith.constant 1.000000e+00 : f32
    %304 = vector.broadcast %cst_152 : f32 to vector<8x1xf32>
    %305 = arith.divf %304, %303 : vector<8x1xf32>
    %306 = vector.broadcast %305 : vector<8x1xf32> to vector<8x8xf32>
    %307 = arith.mulf %301, %306 : vector<8x8xf32>
    %c16_153 = arith.constant 16 : index
    %c0_154 = arith.constant 0 : index
    %308 = vector.load %arg3[%c16_153, %c0_154] : memref<32x8xf32, #tpu.memory_space<vmem>>, vector<8x8xf32>
    %cst_155 = arith.constant dense<0.000000e+00> : vector<8x8xf32>
    %309 = tpu.matmul %307, %308, %cst_155 {dimension_numbers = #tpu.dot_dimension_numbers<[1], [1], [0], [0], [0, 0, 1, 0], [], []>} : vector<8x8xf32>, vector<8x8xf32>, vector<8x8xf32> -> vector<8x8xf32>
    %c0_156 = arith.constant 0 : index
    %c3_157 = arith.constant 3 : index
    %310 = vector.load %arg4[%c0_156, %c3_157] : memref<8x4xf32, #tpu.memory_space<vmem>>, vector<8x1xf32>
    %c3_158 = arith.constant 3 : index
    %c0_159 = arith.constant 0 : index
    %311 = vector.load %arg5[%c3_158, %c0_159] : memref<4x8xf32, #tpu.memory_space<vmem>>, vector<1x8xf32>
    %312 = vector.broadcast %310 : vector<8x1xf32> to vector<8x8xf32>
    %313 = vector.broadcast %311 : vector<1x8xf32> to vector<8x8xf32>
    %314 = arith.addf %312, %313 : vector<8x8xf32>
    %cst_160 = arith.constant 6.000000e-01 : f32
    %315 = vector.broadcast %cst_160 : f32 to vector<8x8xf32>
    %316 = arith.mulf %315, %314 : vector<8x8xf32>
    %317 = arith.addf %6, %316 : vector<8x8xf32>
    %c0_161 = arith.constant 0 : index
    %c24 = arith.constant 24 : index
    %318 = vector.load %arg2[%c0_161, %c24] : memref<8x32xf32, #tpu.memory_space<vmem>>, vector<8x1xf32>
    %c24_162 = arith.constant 24 : index
    %c0_163 = arith.constant 0 : index
    %319 = vector.load %arg3[%c24_162, %c0_163] : memref<32x8xf32, #tpu.memory_space<vmem>>, vector<1x8xf32>
    %320 = vector.broadcast %318 : vector<8x1xf32> to vector<8x8xf32>
    %321 = vector.broadcast %319 : vector<1x8xf32> to vector<8x8xf32>
    %322 = arith.addf %320, %321 : vector<8x8xf32>
    %323 = math.absf %322 : vector<8x8xf32>
    %c0_164 = arith.constant 0 : index
    %c0_165 = arith.constant 0 : index
    %324 = memref.load %arg1[%c0_164, %c0_165] : memref<1x8xf32, #tpu.memory_space<smem>>
    %325 = vector.broadcast %324 : f32 to vector<8x8xf32>
    %326 = arith.mulf %325, %323 : vector<8x8xf32>
    %c0_166 = arith.constant 0 : index
    %c25 = arith.constant 25 : index
    %327 = vector.load %arg2[%c0_166, %c25] : memref<8x32xf32, #tpu.memory_space<vmem>>, vector<8x1xf32>
    %c25_167 = arith.constant 25 : index
    %c0_168 = arith.constant 0 : index
    %328 = vector.load %arg3[%c25_167, %c0_168] : memref<32x8xf32, #tpu.memory_space<vmem>>, vector<1x8xf32>
    %329 = vector.broadcast %327 : vector<8x1xf32> to vector<8x8xf32>
    %330 = vector.broadcast %328 : vector<1x8xf32> to vector<8x8xf32>
    %331 = arith.addf %329, %330 : vector<8x8xf32>
    %332 = math.absf %331 : vector<8x8xf32>
    %c0_169 = arith.constant 0 : index
    %c1_170 = arith.constant 1 : index
    %333 = memref.load %arg1[%c0_169, %c1_170] : memref<1x8xf32, #tpu.memory_space<smem>>
    %334 = vector.broadcast %333 : f32 to vector<8x8xf32>
    %335 = arith.mulf %334, %332 : vector<8x8xf32>
    %336 = arith.addf %326, %335 : vector<8x8xf32>
    %337 = arith.addf %317, %336 : vector<8x8xf32>
    %c0_171 = arith.constant 0 : index
    %c26 = arith.constant 26 : index
    %338 = vector.load %arg2[%c0_171, %c26] : memref<8x32xf32, #tpu.memory_space<vmem>>, vector<8x1xf32>
    %c26_172 = arith.constant 26 : index
    %c0_173 = arith.constant 0 : index
    %339 = vector.load %arg3[%c26_172, %c0_173] : memref<32x8xf32, #tpu.memory_space<vmem>>, vector<1x8xf32>
    %340 = vector.broadcast %338 : vector<8x1xf32> to vector<8x8xf32>
    %341 = vector.broadcast %339 : vector<1x8xf32> to vector<8x8xf32>
    %342 = arith.addf %340, %341 : vector<8x8xf32>
    %343 = math.absf %342 : vector<8x8xf32>
    %c0_174 = arith.constant 0 : index
    %c2_175 = arith.constant 2 : index
    %344 = memref.load %arg1[%c0_174, %c2_175] : memref<1x8xf32, #tpu.memory_space<smem>>
    %345 = vector.broadcast %344 : f32 to vector<8x8xf32>
    %346 = arith.mulf %345, %343 : vector<8x8xf32>
    %c0_176 = arith.constant 0 : index
    %c27 = arith.constant 27 : index
    %347 = vector.load %arg2[%c0_176, %c27] : memref<8x32xf32, #tpu.memory_space<vmem>>, vector<8x1xf32>
    %c27_177 = arith.constant 27 : index
    %c0_178 = arith.constant 0 : index
    %348 = vector.load %arg3[%c27_177, %c0_178] : memref<32x8xf32, #tpu.memory_space<vmem>>, vector<1x8xf32>
    %349 = vector.broadcast %347 : vector<8x1xf32> to vector<8x8xf32>
    %350 = vector.broadcast %348 : vector<1x8xf32> to vector<8x8xf32>
    %351 = arith.addf %349, %350 : vector<8x8xf32>
    %352 = math.absf %351 : vector<8x8xf32>
    %c0_179 = arith.constant 0 : index
    %c3_180 = arith.constant 3 : index
    %353 = memref.load %arg1[%c0_179, %c3_180] : memref<1x8xf32, #tpu.memory_space<smem>>
    %354 = vector.broadcast %353 : f32 to vector<8x8xf32>
    %355 = arith.mulf %354, %352 : vector<8x8xf32>
    %356 = arith.addf %346, %355 : vector<8x8xf32>
    %357 = arith.addf %337, %356 : vector<8x8xf32>
    %c0_181 = arith.constant 0 : index
    %c28 = arith.constant 28 : index
    %358 = vector.load %arg2[%c0_181, %c28] : memref<8x32xf32, #tpu.memory_space<vmem>>, vector<8x1xf32>
    %c28_182 = arith.constant 28 : index
    %c0_183 = arith.constant 0 : index
    %359 = vector.load %arg3[%c28_182, %c0_183] : memref<32x8xf32, #tpu.memory_space<vmem>>, vector<1x8xf32>
    %360 = vector.broadcast %358 : vector<8x1xf32> to vector<8x8xf32>
    %361 = vector.broadcast %359 : vector<1x8xf32> to vector<8x8xf32>
    %362 = arith.addf %360, %361 : vector<8x8xf32>
    %363 = math.absf %362 : vector<8x8xf32>
    %c0_184 = arith.constant 0 : index
    %c4_185 = arith.constant 4 : index
    %364 = memref.load %arg1[%c0_184, %c4_185] : memref<1x8xf32, #tpu.memory_space<smem>>
    %365 = vector.broadcast %364 : f32 to vector<8x8xf32>
    %366 = arith.mulf %365, %363 : vector<8x8xf32>
    %c0_186 = arith.constant 0 : index
    %c29 = arith.constant 29 : index
    %367 = vector.load %arg2[%c0_186, %c29] : memref<8x32xf32, #tpu.memory_space<vmem>>, vector<8x1xf32>
    %c29_187 = arith.constant 29 : index
    %c0_188 = arith.constant 0 : index
    %368 = vector.load %arg3[%c29_187, %c0_188] : memref<32x8xf32, #tpu.memory_space<vmem>>, vector<1x8xf32>
    %369 = vector.broadcast %367 : vector<8x1xf32> to vector<8x8xf32>
    %370 = vector.broadcast %368 : vector<1x8xf32> to vector<8x8xf32>
    %371 = arith.addf %369, %370 : vector<8x8xf32>
    %372 = math.absf %371 : vector<8x8xf32>
    %c0_189 = arith.constant 0 : index
    %c5_190 = arith.constant 5 : index
    %373 = memref.load %arg1[%c0_189, %c5_190] : memref<1x8xf32, #tpu.memory_space<smem>>
    %374 = vector.broadcast %373 : f32 to vector<8x8xf32>
    %375 = arith.mulf %374, %372 : vector<8x8xf32>
    %376 = arith.addf %366, %375 : vector<8x8xf32>
    %377 = arith.addf %357, %376 : vector<8x8xf32>
    %c0_191 = arith.constant 0 : index
    %c30 = arith.constant 30 : index
    %378 = vector.load %arg2[%c0_191, %c30] : memref<8x32xf32, #tpu.memory_space<vmem>>, vector<8x1xf32>
    %c30_192 = arith.constant 30 : index
    %c0_193 = arith.constant 0 : index
    %379 = vector.load %arg3[%c30_192, %c0_193] : memref<32x8xf32, #tpu.memory_space<vmem>>, vector<1x8xf32>
    %380 = vector.broadcast %378 : vector<8x1xf32> to vector<8x8xf32>
    %381 = vector.broadcast %379 : vector<1x8xf32> to vector<8x8xf32>
    %382 = arith.addf %380, %381 : vector<8x8xf32>
    %383 = math.absf %382 : vector<8x8xf32>
    %c0_194 = arith.constant 0 : index
    %c6_195 = arith.constant 6 : index
    %384 = memref.load %arg1[%c0_194, %c6_195] : memref<1x8xf32, #tpu.memory_space<smem>>
    %385 = vector.broadcast %384 : f32 to vector<8x8xf32>
    %386 = arith.mulf %385, %383 : vector<8x8xf32>
    %c0_196 = arith.constant 0 : index
    %c31 = arith.constant 31 : index
    %387 = vector.load %arg2[%c0_196, %c31] : memref<8x32xf32, #tpu.memory_space<vmem>>, vector<8x1xf32>
    %c31_197 = arith.constant 31 : index
    %c0_198 = arith.constant 0 : index
    %388 = vector.load %arg3[%c31_197, %c0_198] : memref<32x8xf32, #tpu.memory_space<vmem>>, vector<1x8xf32>
    %389 = vector.broadcast %387 : vector<8x1xf32> to vector<8x8xf32>
    %390 = vector.broadcast %388 : vector<1x8xf32> to vector<8x8xf32>
    %391 = arith.addf %389, %390 : vector<8x8xf32>
    %392 = math.absf %391 : vector<8x8xf32>
    %c0_199 = arith.constant 0 : index
    %c7_200 = arith.constant 7 : index
    %393 = memref.load %arg1[%c0_199, %c7_200] : memref<1x8xf32, #tpu.memory_space<smem>>
    %394 = vector.broadcast %393 : f32 to vector<8x8xf32>
    %395 = arith.mulf %394, %392 : vector<8x8xf32>
    %396 = arith.addf %386, %395 : vector<8x8xf32>
    %397 = arith.addf %377, %396 : vector<8x8xf32>
    %cst_201 = arith.constant dense<0xFF800000> : vector<8xf32>
    %398 = vector.multi_reduction <maximumf>, %397, %cst_201 [1] : vector<8x8xf32> to vector<8xf32>
    %399 = vector.shape_cast %398 : vector<8xf32> to vector<8x1xf32>
    %400 = vector.broadcast %399 : vector<8x1xf32> to vector<8x8xf32>
    %401 = arith.subf %397, %400 : vector<8x8xf32>
    %402 = math.exp %401 : vector<8x8xf32>
    %cst_202 = arith.constant dense<0.000000e+00> : vector<8xf32>
    %403 = vector.multi_reduction <add>, %402, %cst_202 [1] : vector<8x8xf32> to vector<8xf32>
    %404 = vector.shape_cast %403 : vector<8xf32> to vector<8x1xf32>
    %cst_203 = arith.constant 1.000000e+00 : f32
    %405 = vector.broadcast %cst_203 : f32 to vector<8x1xf32>
    %406 = arith.divf %405, %404 : vector<8x1xf32>
    %407 = vector.broadcast %406 : vector<8x1xf32> to vector<8x8xf32>
    %408 = arith.mulf %402, %407 : vector<8x8xf32>
    %c24_204 = arith.constant 24 : index
    %c0_205 = arith.constant 0 : index
    %409 = vector.load %arg3[%c24_204, %c0_205] : memref<32x8xf32, #tpu.memory_space<vmem>>, vector<8x8xf32>
    %cst_206 = arith.constant dense<0.000000e+00> : vector<8x8xf32>
    %410 = tpu.matmul %408, %409, %cst_206 {dimension_numbers = #tpu.dot_dimension_numbers<[1], [1], [0], [0], [0, 0, 1, 0], [], []>} : vector<8x8xf32>, vector<8x8xf32>, vector<8x8xf32> -> vector<8x8xf32>
    %411 = tpu.concatenate %107, %208, %309, %410 in 1 : vector<8x8xf32>, vector<8x8xf32>, vector<8x8xf32>, vector<8x8xf32> -> vector<8x32xf32>
    %c0_207 = arith.constant 0 : index
    %c0_208 = arith.constant 0 : index
    %412 = vector.load %arg7[%c0_207, %c0_208] : memref<8x32xf32, #tpu.memory_space<vmem>>, vector<8x32xf32>
    tpu.vector_store %arg7[%c0_207, %c0_208], %411 {strides = array<i32>} : memref<8x32xf32, #tpu.memory_space<vmem>>, vector<8x32xf32>,
    return
  }
  func.func @transform_0(%arg0: i32) -> (i32, i32) {
    %c0_i32 = arith.constant 0 : i32
    %c0_i32_0 = arith.constant 0 : i32
    %c0_i32_1 = arith.constant 0 : i32
    return %c0_i32, %c0_i32_0 : i32, i32
  }
  func.func @transform_1(%arg0: i32) -> (i32, i32) {
    %c0_i32 = arith.constant 0 : i32
    %c0_i32_0 = arith.constant 0 : i32
    return %arg0, %c0_i32 : i32, i32
  }
  func.func @transform_2(%arg0: i32) -> (i32, i32) {
    %c0_i32 = arith.constant 0 : i32
    %c0_i32_0 = arith.constant 0 : i32
    %c0_i32_1 = arith.constant 0 : i32
    return %c0_i32, %c0_i32_0 : i32, i32
  }
  func.func @transform_3(%arg0: i32) -> (i32, i32) {
    %c0_i32 = arith.constant 0 : i32
    %c0_i32_0 = arith.constant 0 : i32
    return %arg0, %c0_i32 : i32, i32
  }
  func.func @transform_4(%arg0: i32) -> (i32, i32) {
    %c0_i32 = arith.constant 0 : i32
    %c0_i32_0 = arith.constant 0 : i32
    %c0_i32_1 = arith.constant 0 : i32
    return %c0_i32, %c0_i32_0 : i32, i32
  }
  func.func @transform_5(%arg0: i32) -> (i32, i32) {
    %c0_i32 = arith.constant 0 : i32
    %c0_i32_0 = arith.constant 0 : i32
    return %arg0, %c0_i32 : i32, i32
  }
  func.func @transform_6(%arg0: i32) -> (i32, i32) {
    %c0_i32 = arith.constant 0 : i32
    %c0_i32_0 = arith.constant 0 : i32
    return %arg0, %c0_i32 : i32, i32
  }
}

</mosaic_0001>

<bundles_post_ra>
// kernel: tpu_custom_call.1
= control target key start
LH: loop header
LB: loop body
LE: loop exit
PB: predicated region body
PF: predicated region fallthrough
CT: control target
= control target key end

     0   :  { %11 = vsyncpa [#allocation5], 0  ;;  %s1643_s0 = inlined_call_operand.hbm [shape: f32[1,8], index: 0, kind: input, shape index: {}]   ;;  %s1644_s1 = inlined_call_operand.hbm [shape: f32[8,32], index: 1, kind: input, shape index: {}]   ;;  %s1645_s2 = inlined_call_operand.hbm [shape: f32[32,8], index: 2, kind: input, shape index: {}]   ;;  %s1646_s3 = inlined_call_operand.hbm [shape: f32[8,4], index: 3, kind: input, shape index: {}]   ;;  %s1647_s4 = inlined_call_operand.hbm [shape: f32[4,8], index: 4, kind: input, shape index: {}]   ;;  %s1648_s5 = inlined_call_operand.hbm [shape: s8[8,8], index: 5, kind: input, shape index: {}]   ;;  %s1649_s6 = inlined_call_operand.hbm [shape: f32[8,32], index: 6, kind: output, shape index: {}]  }
   0x1   :  { %12 = vsyncpa [#allocation3], 0 }
   0x2   :  { %13 = vsyncpa [#allocation8], 0 }
   0x3   :  { %14 = vsyncpa [#allocation11], 0 }
   0x4   :  { %15 = vsyncpa [#allocation4], 0  ;;  %s1304_s21 = smov [#allocation7]   ;;  %s1152_s25 = scalar_lea.hbm %s1645_s2, 512 }
   0x5   :  { %s39_s22 = sshll.u32 %s1304_s21, 4  ;;  %p1153_p0 = scmp.ne.s32.totalorder %s1645_s2, %s1152_s25  ;;  %s40_s22 = int_to_ptr.vmem [resolvable:$true] %s39_s22 }
   0x6   :  { %p1156_p1 = scmp.lt.u32.totalorder %s1152_s25, %s1645_s2 }
   0x8   :  { %p1158_p2 = pnand %p1156_p1, %p1153_p0 }
   0xa   :  { %1161 = shalt.err (!%p1158_p2)
}
   0xb   :  { %s1162_s30 = scalar_lea.vmem %s40_s22, 512  ;;  %p1167_p4 = scmp.lt.s32.totalorder %s40_s22, %s40_s22 }
   0xc   :  { %p1163_p3 = scmp.ne.s32.totalorder %s40_s22, %s1162_s30  ;;  %p1168_p5 = scmp.lt.s32.totalorder %s1162_s30, %s1162_s30 }
   0xe   :  { %p1169_p6 = por %p1168_p5, %p1167_p4 }
  0x10   :  { %p1170_p7 = pnand %p1169_p6, %p1163_p3 }
  0x12   :  { %1173 = shalt.err (!%p1170_p7)
}
  0x13   :  { %s1305_s7 = smov 128   ;;  %s1306_s8 = smov 8  }
  0x14   :  { %45 = dma.hbm_to_vmem [thread:$0]  %s1645_s2, 512, %s40_s22, [#allocation8], %s1305_s7, %s1305_s7, %s1306_s8  }
  0x15   :  { %s1307_s11 = smov [#allocation10]   ;;  %s1174_s15 = scalar_lea.hbm %s1647_s4, 64 }
  0x16   :  { %s62_s12 = sshll.u32 %s1307_s11, 4  ;;  %p1175_p8 = scmp.ne.s32.totalorder %s1647_s4, %s1174_s15  ;;  %s63_s12 = int_to_ptr.vmem [resolvable:$true] %s62_s12 }
  0x17   :  { %p1178_p9 = scmp.lt.u32.totalorder %s1174_s15, %s1647_s4 }
  0x19   :  { %p1180_p10 = pnand %p1178_p9, %p1175_p8 }
  0x1b   :  { %1183 = shalt.err (!%p1180_p10)
}
  0x1c   :  { %s1184_s20 = scalar_lea.vmem %s63_s12, 64  ;;  %p1189_p12 = scmp.lt.s32.totalorder %s63_s12, %s63_s12 }
  0x1d   :  { %p1185_p11 = scmp.ne.s32.totalorder %s63_s12, %s1184_s20  ;;  %p1190_p13 = scmp.lt.s32.totalorder %s1184_s20, %s1184_s20 }
  0x1f   :  { %p1191_p0 = por %p1190_p13, %p1189_p12 }
  0x21   :  { %p1192_p1 = pnand %p1191_p0, %p1185_p11 }
  0x23   :  { %1195 = shalt.err (!%p1192_p1)
}
  0x24   :  { %65 = dma.hbm_to_vmem [thread:$0]  %s1647_s4, 64, %s63_s12, [#allocation11]  }
  0x25   :  { %s1196_s24 = scalar_lea.hbm %s1643_s0, 16 }
  0x26   :  { %p1197_p2 = scmp.ne.s32.totalorder %s1643_s0, %s1196_s24  ;;  %p1200_p3 = scmp.lt.u32.totalorder %s1196_s24, %s1643_s0 }
  0x28   :  { %p1202_p4 = pnand %p1200_p3, %p1197_p2 }
  0x2a   :  { %1205 = shalt.err (!%p1202_p4)
}
  0x2b   :  { %s1308_s29 = smov [#allocation2]   ;;  %s1309_s4 = smov [#allocation6]  }
  0x2c   :  { %23 = dma.hbm_to_smem %s1643_s0, 16, %s1308_s29, [#allocation5]  }
  0x2d   :  { %s30_s9 = sshll.u32 %s1309_s4, 4  ;;  %s1310_s10 = smov [#allocation9]   ;;  %s31_s9 = int_to_ptr.vmem [resolvable:$true] %s30_s9 }
  0x2e   :  { %s52_s11 = sshll.u32 %s1310_s10, 4  ;;  %s1206_s14 = scalar_lea.hbm %s1644_s1, 128  ;;  %s53_s11 = int_to_ptr.vmem [resolvable:$true] %s52_s11 }
  0x2f   :  { %p1207_p5 = scmp.ne.s32.totalorder %s1644_s1, %s1206_s14  ;;  %p1210_p6 = scmp.lt.u32.totalorder %s1206_s14, %s1644_s1 }
  0x31   :  { %p1212_p7 = pnand %p1210_p6, %p1207_p5 }
  0x33   :  { %1215 = shalt.err (!%p1212_p7)
}
  0x34   :  { %s1216_s0 = scalar_lea.vmem %s31_s9, 128  ;;  %p1221_p9 = scmp.lt.s32.totalorder %s31_s9, %s31_s9 }
  0x35   :  { %p1217_p8 = scmp.ne.s32.totalorder %s31_s9, %s1216_s0  ;;  %p1222_p10 = scmp.lt.s32.totalorder %s1216_s0, %s1216_s0 }
  0x37   :  { %p1223_p11 = por %p1222_p10, %p1221_p9 }
  0x39   :  { %p1224_p12 = pnand %p1223_p11, %p1217_p8 }
  0x3b   :  { %1227 = shalt.err (!%p1224_p12)
}
  0x3c   :  { %33 = dma.hbm_to_vmem [thread:$0]  %s1644_s1, 128, %s31_s9, [#allocation3]  }
  0x3d   :  { %s1228_s22 = scalar_lea.hbm %s1646_s3, 128 }
  0x3e   :  { %p1229_p13 = scmp.ne.s32.totalorder %s1646_s3, %s1228_s22  ;;  %p1232_p0 = scmp.lt.u32.totalorder %s1228_s22, %s1646_s3 }
  0x40   :  { %p1234_p1 = pnand %p1232_p0, %p1229_p13 }
  0x42   :  { %1237 = shalt.err (!%p1234_p1)
}
  0x43   :  { %s1238_s27 = scalar_lea.vmem %s53_s11, 128  ;;  %p1243_p3 = scmp.lt.s32.totalorder %s53_s11, %s53_s11 }
  0x44   :  { %p1239_p2 = scmp.ne.s32.totalorder %s53_s11, %s1238_s27  ;;  %p1244_p4 = scmp.lt.s32.totalorder %s1238_s27, %s1238_s27 }
  0x46   :  { %p1245_p5 = por %p1244_p4, %p1243_p3 }
  0x48   :  { %p1246_p6 = pnand %p1245_p5, %p1239_p2 }
  0x4a   :  { %1249 = shalt.err (!%p1246_p6)
}
  0x4b   :  { %55 = dma.hbm_to_vmem [thread:$0]  %s1646_s3, 128, %s53_s11, [#allocation8]  }
  0x4c   :  { %s1311_s29 = smov [#allocation12]   ;;  %s1250_s9 = scalar_lea.hbm %s1648_s5, 32 }
  0x4d   :  { %s72_s30 = sshll.u32 %s1311_s29, 4  ;;  %p1251_p7 = scmp.ne.s32.totalorder %s1648_s5, %s1250_s9  ;;  %s73_s30 = int_to_ptr.vmem [resolvable:$true] %s72_s30 }
  0x4e   :  { %p1254_p8 = scmp.lt.u32.totalorder %s1250_s9, %s1648_s5 }
  0x50   :  { %p1256_p9 = pnand %p1254_p8, %p1251_p7 }
  0x52   :  { %1259 = shalt.err (!%p1256_p9)
}
  0x53   :  { %s1260_s15 = scalar_lea.vmem %s73_s30, 32  ;;  %p1265_p11 = scmp.lt.s32.totalorder %s73_s30, %s73_s30 }
  0x54   :  { %p1261_p10 = scmp.ne.s32.totalorder %s73_s30, %s1260_s15  ;;  %p1266_p12 = scmp.lt.s32.totalorder %s1260_s15, %s1260_s15 }
  0x56   :  { %p1267_p13 = por %p1266_p12, %p1265_p11 }
  0x58   :  { %p1268_p0 = pnand %p1267_p13, %p1261_p10 }
  0x5a   :  { %1271 = shalt.err (!%p1268_p0)
}
  0x5b   :  { %75 = dma.hbm_to_vmem [thread:$0]  %s1648_s5, 32, %s73_s30, [#allocation11]  }
  0x5c   :  { %1294 = dma.done.wait [#allocation5], 16  }
  0x5d   :  { %1295 = vsyncadd [#allocation5], 4294967280 }
  0x5e   :  { %1296 = dma.done.wait [#allocation3], 128  }
  0x5f   :  { %1297 = vsyncadd [#allocation3], 4294967168 }
  0x60   :  { %1298 = dma.done.wait [#allocation8], 640  }
  0x61   :  { %1299 = vsyncadd [#allocation8], 4294966656 }
  0x62   :  { %1300 = dma.done.wait [#allocation11], 96  }
  0x63   :  { %1301 = vsyncadd [#allocation11], 4294967200 }
  0x64   :  { %94 = sfence }
  0x65   :  { %v1457_v0 = vld [vmem:[#allocation6] sm:$0xff]  ;;  %v1312_v1 = vmov 8   ;;  %v1313_v2 = vmov 0   ;;  %v1314_v3 = vmov 9   ;;  %v1315_v4 = vmov 1   ;;  %v1463_v5 = vld [vmem:[#allocation9] sm:$0xff] }
  0x66   :  { %1103 = vset.pattern.permute.xlu1 %v1312_v1  ;;  %1101 = vset.pattern.permute.xlu0 %v1313_v2  ;;  %v1316_v6 = vmov 10   ;;  %v1317_v7 = vmov 0.0   ;;  %v1318_v8 = vmov 5   ;;  %v1319_v9 = vmov 3   ;;  %v978_v50 = vld [vmem:[#allocation7] ss:$0 sm:$0xff] }
  0x67   :  { %339 = vperm.xlu1 %1103, %v1457_v0   ;;  %117 = vperm.xlu0 %1101, %v1457_v0   ;;  %v1320_v10 = vmov 12   ;;  %v1321_v11 = vmov 25   ;;  %v1322_v12 = vmov 11   ;;  %v1323_v13 = vmov 2   ;;  %v979_v51 = vld [vmem:[#allocation7 + $0x1] ss:$0 sm:$0xff] }
  0x68   :  { %1036 = vmatprep.subr.mxu0 %v1317_v7  ;;  %1041 = vmatprep.subr.mxu1 %v1317_v7  ;;  %v1324_v14 = vmov 4   ;;  %v1325_v15 = vmov 16   ;;  %v1326_v16 = vmov 14   ;;  %v1327_v17 = vmov 17   ;;  %v95_v52 = vld [vmem:[#allocation12] sm:$0x3] }
  0x69   :  { %v1328_v18 = vmov 26   ;;  %v1329_v19 = vmov 13   ;;  %v1330_v20 = vmov 21   ;;  %v1331_v21 = vmov 24   ;;  %s126_s5 = sld [smem:[#allocation2]]  ;;  %s980_s16 = sld [smem:[#allocation2 + $0x1]] }
  0x6a   :  { %v1332_v22 = vmov 22   ;;  %v1333_v23 = vmov 6   ;;  %v1334_v24 = vmov 31   ;;  %v1335_v25 = vmov 7   ;;  %v981_v55 = vld [vmem:[#allocation7 + $0x2] ss:$0 sm:$0xff] }
  0x6b   :  { %1104 = vset.pattern.permute.xlu1 %v1314_v3  ;;  %1102 = vset.pattern.permute.xlu0 %v1315_v4  ;;  %v1336_v26 = vmov 18   ;;  %v1337_v27 = vmov 19   ;;  %v1338_v28 = vmov 15   ;;  %v1339_v29 = vmov 27   ;;  %v977_v57 = vld [vmem:[#allocation10] ss:$0 sm:$0xff] }
  0x6c   :  { %351 = vperm.xlu1 %1104, %v1457_v0   ;;  %131 = vperm.xlu0 %1102, %v1457_v0   ;;  %v1340_v30 = vmov 20   ;;  %v1341_v31 = vmov 28   ;;  %v1342_v32 = vmov 29   ;;  %v1343_v33 = vmov 23   ;;  %s982_s17 = sld [smem:[#allocation2 + $0x2]]  ;;  %s984_s18 = sld [smem:[#allocation2 + $0x3]] }
  0x6d   :  { %v1344_v34 = vmov 30   ;;  %v96_v58 = vunpack.c.0.s8 %v95_v52  ;;  %v983_v60 = vld [vmem:[#allocation7 + $0x3] ss:$0 sm:$0xff]  ;;  %s988_s0 = sld [smem:[#allocation2 + $0x5]]  ;;  %s986_s19 = sld [smem:[#allocation2 + $0x4]]  ;;  %vm235_vm1 = vcmask 64512  }
  0x6e   :  { %v985_v3 = vld [vmem:[#allocation7 + $0x4] ss:$0 sm:$0xff]  ;;  %s990_s20 = sld [smem:[#allocation2 + $0x6]]  ;;  %s992_s2 = sld [smem:[#allocation2 + $0x7]]  ;;  %vm1345_vm2 = vmmov 0   ;;  %vm953_vm3 = vcmask 130048  }
  0x6f   :  { %vm97_vm0 = vcmp.eq.s32.totalorder %v96_v58, 0  ;;  %1038 = vmatprep.mubr.msk.f32.mxu0 %vm1345_vm2, %v1317_v7  ;;  %1043 = vmatprep.mubr.msk.f32.mxu1 %vm1345_vm2, %v1317_v7  ;;  %s1346_s21 = smov 16   ;;  %s1347_s22 = smov 24   ;;  %vm955_vm4 = vcmask 195584   ;;  %vm957_vm5 = vcmask 261120  }
  0x70   :  { %1105 = vset.pattern.permute.xlu1 %v1313_v2  ;;  %1108 = vset.pattern.permute.xlu0 %v1316_v6  ;;  %v987_v2 = vld [vmem:[#allocation7 + $0x5] ss:$0 sm:$0xff]  ;;  %v1525_v6 = vstv %s980_s16  ;;  %s1348_s23 = smov [#allocation13]  }
  0x71   :  { %365 = vperm.xlu0 %1108, %v1457_v0   ;;  %103 = vperm.xlu1 %1105, %v1463_v5   ;;  %s965_s24 = sshll.u32 %s1348_s23, 4  ;;  %s966_s24 = int_to_ptr.vmem [resolvable:$true] %s965_s24 }
  0x72   :  { %p1277_p2 = scmp.lt.s32.totalorder %s966_s24, %s966_s24 }
  0x74   :  { %v1547_v52 = vstv %s992_s2 }
  0x75   :  { %1111 = vset.pattern.permute.xlu0 %v1318_v8  ;;  %1106 = vset.pattern.permute.xlu1 %v1319_v9 }
  0x76   :  { %191 = vperm.xlu0 %1111, %v1457_v0   ;;  %161 = vperm.xlu1 %1106, %v1457_v0  }
  0x7a   :  { %1114 = vset.pattern.permute.xlu0 %v1320_v10  ;;  %1107 = vset.pattern.permute.xlu1 %v1315_v4 }
  0x7b   :  { %391 = vperm.xlu0 %1114, %v1457_v0   ;;  %327 = vperm.xlu1 %1107, %v1463_v5  }
  0x7f   :  { %1117 = vset.pattern.permute.xlu0 %v1321_v11  ;;  %1109 = vset.pattern.permute.xlu1 %v1322_v12  ;;  %v1530_v12 = vsel %vm97_vm0, -1e+30, %v1317_v7 }
  0x80   :  { %761 = vperm.xlu0 %1117, %v1457_v0   ;;  %377 = vperm.xlu1 %1109, %v1457_v0  }
  0x84   :  { %1118 = vset.pattern.permute.xlu0 %v1323_v13  ;;  %1110 = vset.pattern.permute.xlu1 %v1324_v14 }
  0x85   :  { %147 = vperm.xlu0 %1118, %v1457_v0   ;;  %177 = vperm.xlu1 %1110, %v1457_v0  }
  0x89   :  { %1112 = vset.pattern.permute.xlu1 %v1325_v15  ;;  %532 = vperm.xlu0 %1118, %v1463_v5  }
  0x8a   :  { %544 = vperm.xlu1 %1112, %v1457_v0  }
  0x8d   :  { %1123 = vset.pattern.permute.xlu0 %v1326_v16  ;;  %v1532_v16 = vstv %s982_s17 }
  0x8e   :  { %1113 = vset.pattern.permute.xlu1 %v1327_v17  ;;  %417 = vperm.xlu0 %1123, %v1457_v0   ;;  %v1534_v17 = vstv %s984_s18 }
  0x8f   :  { %556 = vperm.xlu1 %1113, %v1457_v0  }
  0x92   :  { %1126 = vset.pattern.permute.xlu0 %v1328_v18  ;;  %v989_v18 = vld [vmem:[#allocation7 + $0x6] ss:$0 sm:$0xff] }
  0x93   :  { %1115 = vset.pattern.permute.xlu1 %v1329_v19  ;;  %775 = vperm.xlu0 %1126, %v1457_v0  }
  0x94   :  { %403 = vperm.xlu1 %1115, %v1457_v0  }
  0x97   :  { %1129 = vset.pattern.permute.xlu0 %v1330_v20 }
  0x98   :  { %1116 = vset.pattern.permute.xlu1 %v1331_v21  ;;  %608 = vperm.xlu0 %1129, %v1457_v0  }
  0x99   :  { %749 = vperm.xlu1 %1116, %v1457_v0  }
  0x9c   :  { %1132 = vset.pattern.permute.xlu0 %v1332_v22 }
  0x9d   :  { %1119 = vset.pattern.permute.xlu1 %v1333_v23  ;;  %622 = vperm.xlu0 %1132, %v1457_v0  }
  0x9e   :  { %207 = vperm.xlu1 %1119, %v1457_v0  }
  0xa1   :  { %1135 = vset.pattern.permute.xlu0 %v1334_v24 }
  0xa2   :  { %1120 = vset.pattern.permute.xlu1 %v1335_v25  ;;  %839 = vperm.xlu0 %1135, %v1457_v0  }
  0xa3   :  { %221 = vperm.xlu1 %1120, %v1457_v0  }
  0xa7   :  { %1121 = vset.pattern.permute.xlu1 %v1336_v26 }
  0xa8   :  { %570 = vperm.xlu1 %1121, %v1457_v0  }
  0xac   :  { %1122 = vset.pattern.permute.xlu1 %v1337_v27  ;;  %v1539_v27 = vstv %s988_s0 }
  0xad   :  { %582 = vperm.xlu1 %1122, %v1457_v0  }
  0xb1   :  { %1124 = vset.pattern.permute.xlu1 %v1338_v28  ;;  %v1541_v28 = vstv %s986_s19 }
  0xb2   :  { %429 = vperm.xlu1 %1124, %v1457_v0  }
  0xb6   :  { %1125 = vset.pattern.permute.xlu1 %v1319_v9 }
  0xb7   :  { %737 = vperm.xlu1 %1125, %v1463_v5   ;;  %v1523_v5 = vstv %s126_s5 }
  0xbb   :  { %1127 = vset.pattern.permute.xlu1 %v1339_v29  ;;  %v991_v29 = vld [vmem:[#allocation7 + $0x7] ss:$0 sm:$0xff] }
  0xbc   :  { %787 = vperm.xlu1 %1127, %v1457_v0  }
  0xc0   :  { %1128 = vset.pattern.permute.xlu1 %v1340_v30 }
  0xc1   :  { %596 = vperm.xlu1 %1128, %v1457_v0  }
  0xc5   :  { %1130 = vset.pattern.permute.xlu1 %v1341_v31  ;;  %v997_v31 = vld [vmem:[#allocation7 + $0x9] ss:$0 sm:$0xff] }
  0xc6   :  { %801 = vperm.xlu1 %1130, %v1457_v0  }
  0xca   :  { %1131 = vset.pattern.permute.xlu1 %v1342_v32 }
  0xcb   :  { %813 = vperm.xlu1 %1131, %v1457_v0  }
  0xcf   :  { %1133 = vset.pattern.permute.xlu1 %v1343_v33 }
  0xd0   :  { %634 = vperm.xlu1 %1133, %v1457_v0  }
  0xd4   :  { %1134 = vset.pattern.permute.xlu1 %v1344_v34  ;;  %v998_v34 = vld [vmem:[#allocation7 + $0xa] ss:$0 sm:$0xff] }
  0xd5   :  { %827 = vperm.xlu1 %1134, %v1457_v0  }
  0xe6   :  { %v1501_v35 = vpop.permute.xlu1 %339  ;;  %v118_v37 = vpop.permute.xlu0 %117 }
  0xe7   :  { %v124_v53 = vadd.f32 %v978_v50, %v118_v37  ;;  %v995_v50 = vld [vmem:[#allocation10 + $0x1] ss:$0 sm:$0xff] }
  0xe9   :  { %v125_v62 = vand.u32 2147483647, %v124_v53  ;;  %v1000_v53 = vld [vmem:[#allocation7 + $0xc] ss:$0 sm:$0xff] }
  0xeb   :  { %v1503_v36 = vpop.permute.xlu1 %351  ;;  %v132_v40 = vpop.permute.xlu0 %131  ;;  %v128_v9 = vmul.f32 %v1523_v5, %v125_v62 }
  0xec   :  { %v138_v54 = vadd.f32 %v979_v51, %v132_v40  ;;  %v1545_v51 = vstv %s990_s20  ;;  %v358_v58 = vadd.f32 %v997_v31, %v1503_v36 }
  0xee   :  { %v139_v63 = vand.u32 2147483647, %v138_v54 }
  0xf0   :  { %v104_v38 = vpop.permute.xlu1 %103  ;;  %v1505_v41 = vpop.permute.xlu0 %365  ;;  %v142_v10 = vmul.f32 %v1525_v6, %v139_v63 }
  0xf1   :  { %v110_v0 = vadd.f32 %v977_v57, %v104_v38  ;;  %v999_v38 = vld [vmem:[#allocation7 + $0xb] ss:$0 sm:$0xff] }
  0xf2   :  { %v143_v21 = vadd.f32 %v142_v10, %v128_v9 }
  0xf3   :  { %v111_v11 = vmul.f32 0.6, %v110_v0 }
  0xf5   :  { %v162_v39 = vpop.permute.xlu1 %161  ;;  %v192_v44 = vpop.permute.xlu0 %191  ;;  %v112_v22 = vadd.f32 %v111_v11, %v1530_v12  ;;  %v359_v11 = vand.u32 2147483647, %v358_v58 }
  0xf6   :  { %v168_v1 = vadd.f32 %v983_v60, %v162_v39  ;;  %v198_v14 = vadd.f32 %v987_v2, %v192_v44  ;;  %v372_v60 = vadd.f32 %v998_v34, %v1505_v41  ;;  %v1002_v41 = vld [vmem:[#allocation7 + $0xe] ss:$0 sm:$0xff] }
  0xf7   :  { %v144_v32 = vadd.f32 %v143_v21, %v112_v22 }
  0xf8   :  { %v169_v13 = vand.u32 2147483647, %v168_v1  ;;  %v199_v24 = vand.u32 2147483647, %v198_v14 }
  0xfa   :  { %v1507_v42 = vpop.permute.xlu1 %327  ;;  %v1511_v46 = vpop.permute.xlu0 %391  ;;  %v172_v23 = vmul.f32 %v1534_v17, %v169_v13  ;;  %v202_v37 = vmul.f32 %v1539_v27, %v199_v24 }
  0xff   :  { %v1509_v43 = vpop.permute.xlu1 %377  ;;  %v1515_v48 = vpop.permute.xlu0 %761 }
 0x104   :  { %v178_v45 = vpop.permute.xlu1 %177  ;;  %v148_v56 = vpop.permute.xlu0 %147 }
 0x105   :  { %v154_v61 = vadd.f32 %v981_v55, %v148_v56  ;;  %v184_v15 = vadd.f32 %v985_v3, %v178_v45  ;;  %v996_v45 = vld [vmem:[#allocation7 + $0x8] ss:$0 sm:$0xff]  ;;  %v1001_v55 = vld [vmem:[#allocation7 + $0xd] ss:$0 sm:$0xff]  ;;  %v334_v3 = vadd.f32 %v995_v50, %v1507_v42 }
 0x106   :  { %v346_v62 = vadd.f32 %v996_v45, %v1501_v35  ;;  %v373_v35 = vand.u32 2147483647, %v372_v60 }
 0x107   :  { %v155_v8 = vand.u32 2147483647, %v154_v61  ;;  %v185_v25 = vand.u32 2147483647, %v184_v15  ;;  %v384_v61 = vadd.f32 %v999_v38, %v1509_v43 }
 0x108   :  { %v1549_v54 = vpop.permute.xlu0 %532  ;;  %v347_v14 = vand.u32 2147483647, %v346_v62  ;;  %v374_v22 = vmul.f32 %v373_v35, %v1532_v16  ;;  %v1008_v62 = vld [vmem:[#allocation7 + $0x11] ss:$0 sm:$0xff] }
 0x109   :  { %v1513_v47 = vpop.permute.xlu1 %544  ;;  %v158_v19 = vmul.f32 %v1532_v16, %v155_v8  ;;  %v188_v39 = vmul.f32 %v1541_v28, %v185_v25  ;;  %v398_v8 = vadd.f32 %v1000_v53, %v1511_v46  ;;  %v385_v13 = vand.u32 2147483647, %v384_v61  ;;  %v1003_v25 = vld [vmem:[#allocation7 + $0xf] ss:$0 sm:$0xff] }
 0x10a   :  { %v348_v24 = vmul.f32 %v347_v14, %v1523_v5  ;;  %v1019_v14 = vld [vmem:[#allocation7 + $0x19] ss:$0 sm:$0xff] }
 0x10b   :  { %v173_v30 = vadd.f32 %v172_v23, %v158_v19  ;;  %v203_v63 = vadd.f32 %v202_v37, %v188_v39  ;;  %v399_v19 = vand.u32 2147483647, %v398_v8  ;;  %v386_v23 = vmul.f32 %v385_v13, %v1534_v17  ;;  %v1006_v8 = vld [vmem:[#allocation10 + $0x2] ss:$0 sm:$0xff] }
 0x10c   :  { %v539_v35 = vadd.f32 %v1006_v8, %v1549_v54 }
 0x10d   :  { %v174_v57 = vadd.f32 %v173_v30, %v144_v32  ;;  %v418_v43 = vpop.permute.xlu0 %417  ;;  %v387_v34 = vadd.f32 %v386_v23, %v374_v22  ;;  %v1017_v23 = vld [vmem:[#allocation10 + $0x3] ss:$0 sm:$0xff] }
 0x10e   :  { %v1517_v49 = vpop.permute.xlu1 %556  ;;  %v424_v42 = vadd.f32 %v1002_v41, %v418_v43  ;;  %v1012_v41 = vld [vmem:[#allocation7 + $0x15] ss:$0 sm:$0xff]  ;;  %v1011_v43 = vld [vmem:[#allocation7 + $0x14] ss:$0 sm:$0xff] }
 0x10f   :  { %v204_v36 = vadd.f32 %v203_v63, %v174_v57  ;;  %v1007_v63 = vld [vmem:[#allocation7 + $0x10] ss:$0 sm:$0xff] }
 0x110   :  { %v425_v31 = vand.u32 2147483647, %v424_v42 }
 0x112   :  { %v776_v60 = vpop.permute.xlu0 %775 }
 0x113   :  { %v1519_v59 = vpop.permute.xlu1 %403 }
 0x114   :  { %v410_v9 = vadd.f32 %v1001_v55, %v1519_v59  ;;  %v360_v59 = vmul.f32 %v359_v11, %v1525_v6 }
 0x118   :  { %v1521_v4 = vpop.permute.xlu1 %749 }
 0x11d   :  { %v208_v20 = vpop.permute.xlu1 %207 }
 0x11e   :  { %v214_v26 = vadd.f32 %v989_v18, %v208_v20  ;;  %v335_v18 = vmul.f32 0.6, %v334_v3  ;;  %v411_v20 = vand.u32 2147483647, %v410_v9  ;;  %v551_v3 = vadd.f32 %v1007_v63, %v1513_v47  ;;  %v1010_v9 = vld [vmem:[#allocation7 + $0x13] ss:$0 sm:$0xff] }
 0x120   :  { %v215_v40 = vand.u32 2147483647, %v214_v26  ;;  %v336_v26 = vadd.f32 %v335_v18, %v1530_v12  ;;  %v412_v30 = vmul.f32 %v411_v20, %v1539_v27  ;;  %v552_v18 = vand.u32 2147483647, %v551_v3  ;;  %v1018_v20 = vld [vmem:[#allocation7 + $0x18] ss:$0 sm:$0xff] }
 0x122   :  { %v222_v33 = vpop.permute.xlu1 %221  ;;  %v218_v0 = vmul.f32 %v1545_v51, %v215_v40  ;;  %v426_v40 = vmul.f32 %v425_v31, %v1545_v51  ;;  %v756_v31 = vadd.f32 %v1018_v20, %v1521_v4 }
 0x123   :  { %v228_v44 = vadd.f32 %v991_v29, %v222_v33  ;;  %v400_v29 = vmul.f32 %v399_v19, %v1541_v28  ;;  %v361_v33 = vadd.f32 %v360_v59, %v348_v24  ;;  %v1013_v24 = vld [vmem:[#allocation7 + $0x16] ss:$0 sm:$0xff] }
 0x124   :  { %v757_v4 = vand.u32 2147483647, %v756_v31 }
 0x125   :  { %v229_v56 = vand.u32 2147483647, %v228_v44  ;;  %v362_v38 = vadd.f32 %v361_v33, %v336_v26  ;;  %v413_v39 = vadd.f32 %v412_v30, %v400_v29  ;;  %v540_v29 = vmul.f32 0.6, %v539_v35  ;;  %v1022_v33 = vld [vmem:[#allocation7 + $0x1c] ss:$0 sm:$0xff] }
 0x126   :  { %v553_v30 = vmul.f32 %v552_v18, %v1523_v5 }
 0x127   :  { %v232_v1 = vmul.f32 %v1547_v52, %v229_v56  ;;  %v1557_v2 = vpop.permute.xlu1 %570  ;;  %v388_v53 = vadd.f32 %v387_v34, %v362_v38 }
 0x129   :  { %v233_v10 = vadd.f32 %v232_v1, %v218_v0  ;;  %v414_v55 = vadd.f32 %v413_v39, %v388_v53  ;;  %v563_v0 = vadd.f32 %v1008_v62, %v1517_v49  ;;  %v1020_v49 = vld [vmem:[#allocation7 + $0x1a] ss:$0 sm:$0xff]  ;;  %v1025_v62 = vld [vmem:[#allocation7 + $0x1f] ss:$0 sm:$0xff] }
 0x12b   :  { %v1562_v15 = vadd.f32 %v233_v10, %v204_v36  ;;  %v609_v36 = vpop.permute.xlu0 %608  ;;  %v1009_v10 = vld [vmem:[#allocation7 + $0x12] ss:$0 sm:$0xff]  ;;  %v564_v11 = vand.u32 2147483647, %v563_v0 }
 0x12c   :  { %v583_v21 = vpop.permute.xlu1 %582  ;;  %v577_v42 = vadd.f32 %v1009_v10, %v1557_v2  ;;  %v615_v59 = vadd.f32 %v1012_v41, %v609_v36 }
 0x12d   :  { %v236_v46 = vsel %vm235_vm1, %v1562_v15, -inf  ;;  %v589_v13 = vadd.f32 %v1010_v9, %v583_v21  ;;  %v565_v26 = vmul.f32 %v564_v11, %v1525_v6  ;;  %v1023_v21 = vld [vmem:[#allocation7 + $0x1d] ss:$0 sm:$0xff] }
 0x12e   :  { %237 = vmax.xlane.f32.xlu1 %v236_v46  ;;  %v1021_v46 = vld [vmem:[#allocation7 + $0x1b] ss:$0 sm:$0xff]  ;;  %v578_v34 = vand.u32 2147483647, %v577_v42 }
 0x12f   :  { %v623_v22 = vpop.permute.xlu0 %622  ;;  %v590_v54 = vand.u32 2147483647, %v589_v13  ;;  %v566_v53 = vadd.f32 %v565_v26, %v553_v30  ;;  %v758_v13 = vmul.f32 %v757_v4, %v1523_v5 }
 0x131   :  { %v430_v32 = vpop.permute.xlu1 %429 }
 0x132   :  { %v436_v37 = vadd.f32 %v1003_v25, %v430_v32  ;;  %v768_v25 = vadd.f32 %v1019_v14, %v1515_v48  ;;  %v782_v32 = vadd.f32 %v1020_v49, %v776_v60 }
 0x133   :  { %v840_v63 = vpop.permute.xlu0 %839 }
 0x134   :  { %v437_v44 = vand.u32 2147483647, %v436_v37  ;;  %v616_v37 = vand.u32 2147483647, %v615_v59  ;;  %v769_v48 = vand.u32 2147483647, %v768_v25  ;;  %v846_v41 = vadd.f32 %v1025_v62, %v840_v63 }
 0x135   :  { %v783_v60 = vand.u32 2147483647, %v782_v32  ;;  %v1024_v59 = vld [vmem:[#allocation7 + $0x1e] ss:$0 sm:$0xff]  ;;  %v453_v62 = vld [vmem:[#allocation7 + $0x8] sm:$0xff] }
 0x136   :  { %v438_v45 = vmul.f32 %v437_v44, %v1547_v52  ;;  %v738_v50 = vpop.permute.xlu1 %737  ;;  %v617_v3 = vmul.f32 %v616_v37, %v1539_v27  ;;  %1042 = vmatpush3.xpose.msk.msra.mxu1 %vm235_vm1, %v453_v62 }
 0x137   :  { %v744_v44 = vadd.f32 %v1017_v23, %v738_v50  ;;  %v784_v14 = vmul.f32 %v783_v60, %v1532_v16  ;;  %1051 = vmatprep.subr.mxu1 %v1317_v7 }
 0x138   :  { %v439_v56 = vadd.f32 %v438_v45, %v426_v40  ;;  %v629_v40 = vadd.f32 %v1013_v24, %v623_v22 }
 0x139   :  { %v745_v9 = vmul.f32 0.6, %v744_v44 }
 0x13a   :  { %v1575_v57 = vadd.f32 %v439_v56, %v414_v55  ;;  %v541_v55 = vadd.f32 %v540_v29, %v1530_v12  ;;  %v591_v56 = vmul.f32 %v590_v54, %v1534_v17  ;;  %v630_v8 = vand.u32 2147483647, %v629_v40 }
 0x13b   :  { %v788_v58 = vpop.permute.xlu1 %787 }
 0x13c   :  { %v441_v61 = vsel %vm235_vm1, %v1575_v57, -inf  ;;  %v794_v2 = vadd.f32 %v1021_v46, %v788_v58  ;;  %v567_v20 = vadd.f32 %v566_v53, %v541_v55  ;;  %v631_v49 = vmul.f32 %v630_v8, %v1545_v51 }
 0x13d   :  { %442 = vmax.xlane.f32.xlu0 %v441_v61  ;;  %v1014_v61 = vld [vmem:[#allocation7 + $0x17] ss:$0 sm:$0xff] }
 0x13e   :  { %v795_v58 = vand.u32 2147483647, %v794_v2 }
 0x140   :  { %v597_v1 = vpop.permute.xlu1 %596  ;;  %v796_v18 = vmul.f32 %v795_v58, %v1534_v17 }
 0x141   :  { %v603_v47 = vadd.f32 %v1011_v43, %v597_v1  ;;  %v579_v1 = vmul.f32 %v578_v34, %v1532_v16  ;;  %v770_v43 = vmul.f32 %v769_v48, %v1525_v6  ;;  %v847_v6 = vand.u32 2147483647, %v846_v41 }
 0x142   :  { %v797_v16 = vadd.f32 %v796_v18, %v784_v14 }
 0x143   :  { %v604_v38 = vand.u32 2147483647, %v603_v47  ;;  %v592_v11 = vadd.f32 %v591_v56, %v579_v1  ;;  %v746_v47 = vadd.f32 %v745_v9, %v1530_v12  ;;  %v771_v25 = vadd.f32 %v770_v43, %v758_v13 }
 0x144   :  { %v848_v31 = vmul.f32 %v847_v6, %v1547_v52 }
 0x145   :  { %v802_v19 = vpop.permute.xlu1 %801  ;;  %v605_v50 = vmul.f32 %v604_v38, %v1541_v28  ;;  %v593_v5 = vadd.f32 %v592_v11, %v567_v20 }
 0x146   :  { %v808_v0 = vadd.f32 %v1022_v33, %v802_v19 }
 0x147   :  { %v618_v42 = vadd.f32 %v617_v3, %v605_v50 }
 0x148   :  { %v809_v19 = vand.u32 2147483647, %v808_v0 }
 0x149   :  { %v619_v29 = vadd.f32 %v618_v42, %v593_v5 }
 0x14a   :  { %v814_v39 = vpop.permute.xlu1 %813  ;;  %v810_v17 = vmul.f32 %v809_v19, %v1541_v28 }
 0x14b   :  { %v820_v45 = vadd.f32 %v1023_v21, %v814_v39  ;;  %v772_v21 = vadd.f32 %v771_v25, %v746_v47 }
 0x14d   :  { %v821_v36 = vand.u32 2147483647, %v820_v45  ;;  %v798_v2 = vadd.f32 %v797_v16, %v772_v21 }
 0x14f   :  { %v635_v10 = vpop.permute.xlu1 %634  ;;  %v822_v22 = vmul.f32 %v821_v36, %v1539_v27 }
 0x150   :  { %v641_v35 = vadd.f32 %v1014_v61, %v635_v10  ;;  %v248_v61 = vld [vmem:[#allocation7] sm:$0xff]  ;;  %v658_v10 = vld [vmem:[#allocation7 + $0x10] sm:$0xff] }
 0x151   :  { %v823_v30 = vadd.f32 %v822_v22, %v810_v17  ;;  %1037 = vmatpush3.xpose.msk.msra.mxu0 %vm235_vm1, %v248_v61 }
 0x152   :  { %v642_v46 = vand.u32 2147483647, %v641_v35  ;;  %1046 = vmatprep.subr.mxu0 %v1317_v7  ;;  %v863_v35 = vld [vmem:[#allocation7 + $0x18] sm:$0xff] }
 0x153   :  { %v824_v34 = vadd.f32 %v823_v30, %v798_v2 }
 0x154   :  { %v643_v23 = vmul.f32 %v642_v46, %v1547_v52  ;;  %v828_v24 = vpop.permute.xlu1 %827 }
 0x155   :  { %v834_v26 = vadd.f32 %v1024_v59, %v828_v24 }
 0x156   :  { %v644_v54 = vadd.f32 %v643_v23, %v631_v49 }
 0x157   :  { %v835_v32 = vand.u32 2147483647, %v834_v26 }
 0x158   :  { %v645_v12 = vadd.f32 %v644_v54, %v619_v29 }
 0x159   :  { %v836_v27 = vmul.f32 %v835_v32, %v1545_v51 }
 0x15a   :  { %v646_v33 = vsel %vm235_vm1, %v645_v12, -inf }
 0x15b   :  { %647 = vmax.xlane.f32.xlu1 %v646_v33  ;;  %v849_v37 = vadd.f32 %v848_v31, %v836_v27 }
 0x15d   :  { %v850_v38 = vadd.f32 %v849_v37, %v824_v34 }
 0x15f   :  { %v851_v28 = vsel %vm235_vm1, %v850_v38, -inf }
 0x160   :  { %852 = vmax.xlane.f32.xlu0 %v851_v28 }
 0x1bb   :  { %v238_v39 = vpop.xlane.xlu1 %237 }
 0x1bc   :  { %v239_v40 = vsub.f32 %v1562_v15, %v238_v39 }
 0x1be   :  { %v240_v44 = vmul.f32 1.442695, %v239_v40 }
 0x1c0   :  { %1136 = vpow2.f32 %v240_v44 }
 0x1ca   :  { %v1137_v52 = vpop.eup %1136  ;;  %v443_v45 = vpop.xlane.xlu0 %442 }
 0x1cb   :  { %v444_v48 = vsub.f32 %v1575_v57, %v443_v45  ;;  %v242_v51 = vsel %vm235_vm1, %v1137_v52, 0.0 }
 0x1cc   :  { %243 = vadd.xlane.f32.xlu1 %v242_v51 }
 0x1cd   :  { %v445_v53 = vmul.f32 1.442695, %v444_v48 }
 0x1cf   :  { %1138 = vpow2.f32 %v445_v53 }
 0x1d9   :  { %v1139_v55 = vpop.eup %1138 }
 0x1da   :  { %v447_v56 = vsel %vm235_vm1, %v1139_v55, 0.0 }
 0x1db   :  { %448 = vadd.xlane.f32.xlu0 %v447_v56 }
 0x1e8   :  { %v648_v15 = vpop.xlane.xlu1 %647 }
 0x1e9   :  { %v649_v57 = vsub.f32 %v645_v12, %v648_v15 }
 0x1eb   :  { %v650_v63 = vmul.f32 1.442695, %v649_v57 }
 0x1ed   :  { %1140 = vpow2.f32 %v650_v63  ;;  %v853_v4 = vpop.xlane.xlu0 %852 }
 0x1ee   :  { %v854_v60 = vsub.f32 %v850_v38, %v853_v4 }
 0x1f0   :  { %v855_v58 = vmul.f32 1.442695, %v854_v60 }
 0x1f2   :  { %1142 = vpow2.f32 %v855_v58 }
 0x1f7   :  { %v1141_v0 = vpop.eup %1140 }
 0x1f8   :  { %v652_v1 = vsel %vm235_vm1, %v1141_v0, 0.0 }
 0x1f9   :  { %653 = vadd.xlane.f32.xlu1 %v652_v1 }
 0x1fc   :  { %v1143_v3 = vpop.eup %1142 }
 0x1fd   :  { %v857_v50 = vsel %vm235_vm1, %v1143_v3, 0.0 }
 0x1fe   :  { %858 = vadd.xlane.f32.xlu0 %v857_v50 }
 0x259   :  { %v244_v8 = vpop.xlane.xlu1 %243 }
 0x25a   :  { %1144 = vrcp.f32 %v244_v8 }
 0x264   :  { %v1145_v9 = vpop.eup %1144 }
 0x265   :  { %v247_v36 = vmul.f32 %v1145_v9, %v1137_v52 }
 0x267   :  { %1039 = vmatmul.mubr.msk.f32.vlgmr.msra.gmra.mrb[0].mxu0 %vm235_vm1, %v247_v36 }
 0x268   :  { %v449_v41 = vpop.xlane.xlu0 %448  ;;  %1047 = vmatpush3.xpose.msk.msra.mxu0 %vm235_vm1, %v658_v10  ;;  %1048 = vmatprep.mubr.msk.f32.mxu0 %vm1345_vm2, %v1317_v7 }
 0x269   :  { %1146 = vrcp.f32 %v449_v41 }
 0x273   :  { %v1147_v43 = vpop.eup %1146 }
 0x274   :  { %v452_v11 = vmul.f32 %v1147_v43, %v1139_v55 }
 0x276   :  { %1044 = vmatmul.mubr.msk.f32.vlgmr.msra.gmra.mrb[0].mxu1 %vm235_vm1, %v452_v11 }
 0x277   :  { %1052 = vmatpush3.xpose.msk.msra.mxu1 %vm235_vm1, %v863_v35  ;;  %1053 = vmatprep.mubr.msk.f32.mxu1 %vm1345_vm2, %v1317_v7 }
 0x286   :  { %v654_v13 = vpop.xlane.xlu1 %653 }
 0x287   :  { %1148 = vrcp.f32 %v654_v13 }
 0x28b   :  { %v859_v14 = vpop.xlane.xlu0 %858 }
 0x28c   :  { %1150 = vrcp.f32 %v859_v14 }
 0x291   :  { %v1149_v18 = vpop.eup %1148 }
 0x292   :  { %v657_v19 = vmul.f32 %v1149_v18, %v1141_v0 }
 0x294   :  { %1049 = vmatmul.mubr.msk.f32.vlgmr.msra.gmra.mrb[2].mxu0 %vm235_vm1, %v657_v19 }
 0x296   :  { %v1151_v20 = vpop.eup %1150 }
 0x297   :  { %v862_v42 = vmul.f32 %v1151_v20, %v1143_v3 }
 0x299   :  { %1054 = vmatmul.mubr.msk.f32.vlgmr.msra.gmra.mrb[2].mxu1 %vm235_vm1, %v862_v42 }
 0x33a   :  { %v321_v49 = vpop.f32.mrb[0].mxu0 }
 0x33b   :  { %v1040_v46 = vpop.f32.mrb[1].mxu0 }
 0x349   :  { %v526_v59 = vpop.f32.mrb[0].mxu1 }
 0x34a   :  { %v1045_v47 = vpop.f32.mrb[1].mxu1  ;;  %941 = vrot.lane.b32.xlu1 %v526_v59, %s1306_s8  ;;  %s1272_s8 = scalar_lea.vmem %s966_s24, 128 }
 0x34b   :  { %p1273_p1 = scmp.ne.s32.totalorder %s966_s24, %s1272_s8  ;;  %p1278_p3 = scmp.lt.s32.totalorder %s1272_s8, %s1272_s8 }
 0x34d   :  { %p1279_p4 = por %p1278_p3, %p1277_p2 }
 0x34f   :  { %p1280_p5 = pnand %p1279_p4, %p1273_p1 }
 0x367   :  { %v731_v22 = vpop.f32.mrb[2].mxu0 }
 0x368   :  { %945 = vrot.lane.b32.xlu0 %v731_v22, %s1346_s21  ;;  %v1050_v7 = vpop.f32.mrb[3].mxu0 }
 0x36c   :  { %v936_v6 = vpop.f32.mrb[2].mxu1 }
 0x36d   :  { %v1055_v23 = vpop.f32.mrb[3].mxu1  ;;  %949 = vrot.lane.b32.xlu1 %v936_v6, %s1347_s22 }
 0x3bc   :  { %v942_v24 = vpop.permute.xlu1 %941 }
 0x3bd   :  { %v952_v25 = vsel %vm235_vm1, %v321_v49, %v942_v24 }
 0x3da   :  { %v946_v5 = vpop.permute.xlu0 %945 }
 0x3db   :  { %v954_v16 = vsel %vm953_vm3, %v952_v25, %v946_v5 }
 0x3df   :  { %v950_v17 = vpop.permute.xlu1 %949 }
 0x3e0   :  { %v956_v26 = vsel %vm955_vm4, %v954_v16, %v950_v17 }
 0x3e1   :  { %958 = vst.msk [vmem:[#allocation13] sm:$0xff] %vm957_vm5, %v956_v26 }
 0x3e2   :  { %1283 = shalt.err (!%p1280_p5)
}
 0x3e3   :  { %s1284_s27 = scalar_lea.hbm %s1649_s6, 128 }
 0x3e4   :  { %p1285_p6 = scmp.ne.s32.totalorder %s1649_s6, %s1284_s27  ;;  %p1288_p7 = scmp.lt.u32.totalorder %s1284_s27, %s1649_s6 }
 0x3e6   :  { %p1290_p8 = pnand %p1288_p7, %p1285_p6 }
 0x3e8   :  { %1293 = shalt.err (!%p1290_p8)
}
 0x3e9   :  { %968 = dma.vmem_to_hbm [thread:$0]  %s966_s24, 128, %s1649_s6, [#allocation4]  }
 0x3ea   :  { %1302 = dma.done.wait [#allocation4], 128  }
 0x3eb   :  { %1303 = vsyncadd [#allocation4], 4294967168 }
 0x3ec   :  { %972 = vsyncpa [#allocation3], 1 }
 0x3ed   :  { %973 = vsyncpa [#allocation8], 1 }
 0x3ee   :  { %974 = vsyncpa [#allocation11], 1 }
 0x3ef   :  { %975 = vsyncpa [#allocation4], 1 }
 0x3f0   :  { %976 = vsyncpa [#allocation5], 1 }

</bundles_post_ra>
